<compile_context>
chip_gen: v7x
topology: tpu7x:2x2x1
jax: 0.10.0
libtpu: 0.0.40
codegen_flags: <defaults>
</compile_context>

<pallas_src>
import math
import functools

import jax
import jax.numpy as jnp
from jax import lax
from jax.experimental import pallas as pl
from jax.experimental.pallas import tpu as pltpu


# ----------------------------- hardware helpers -----------------------------

def _vmem_capacity_bytes():
    try:
        return int(pltpu.get_tpu_info().vmem_capacity_bytes)
    except Exception:
        return 64 << 20          # unknown chip -> conservative (v7x-sized)


def _vmem_limit_bytes():
    # Half of physical VMEM: 64 MiB on v5e/v6e (128 MiB), 32 MiB on v7x (64 MiB).
    return min(_vmem_capacity_bytes() // 2, 96 << 20)


def _pick_tile(dim, target, align):
    """Largest divisor of `dim` that is <= target and a multiple of `align`;
    falls back to the full dim (always a legal block size)."""
    if dim <= target:
        return dim
    t = (target // align) * align
    while t >= align:
        if dim % t == 0:
            return t
        t -= align
    return dim


def _pick_head_block(nhead, tl, S, d_k, budget):
    """Heads per attention grid step, bounded by a per-generation VMEM budget
    (includes the double-buffered (tl, S) f32 weights output block) and the
    (8,128) block rule (h_blk == nhead or h_blk a multiple of 8)."""
    def fits(hb):
        row = hb * d_k * 2                              # bf16 bytes per seq row
        io = 2 * (tl + 2 * S) * row                     # double-buffered q/k/v blocks
        io += 2 * tl * row                              # double-buffered output block
        io += 2 * tl * S * 4                            # double-buffered f32 weights block
        tmp = 3 * hb * tl * S * 4                       # scores / exp / attn (f32)
        tmp += (tl + 2 * S) * row + hb * tl * d_k * 4   # head-major copies + PV result
        return io + tmp <= budget

    if fits(nhead):
        return nhead
    cands = sorted((h for h in range(8, nhead, 8) if nhead % h == 0), reverse=True)
    for hb in cands:
        if fits(hb):
            return hb
    # Best effort: smallest legal head block rather than silently exceeding budget.
    return cands[-1] if cands else nhead


# --------------------- resident-weight (fused) projections ------------------

def _fused_proj_kernel(x_ref, *refs, n_proj):
    """refs = (w_0, b_0, ..., w_{n-1}, b_{n-1}, o_0, ..., o_{n-1}).

    One M-tile of activations (f32, cast to bf16 once in VMEM), all weights
    VMEM-resident; back-to-back MXU matmuls, one lane-dense store per output.
    """
    x = x_ref[...].astype(jnp.bfloat16)
    for i in range(n_proj):
        w_ref = refs[2 * i]
        b_ref = refs[2 * i + 1]
        o_ref = refs[2 * n_proj + i]
        # y = x @ w.T without materializing a transpose (contract dim 1 with dim 1).
        acc = lax.dot_general(x, w_ref[...],
                              dimension_numbers=(((1,), (1,)), ((), ())),
                              preferred_element_type=jnp.float32)
        o_ref[...] = (acc + b_ref[...]).astype(o_ref.dtype)


def fused_projections(x, weights, biases, out_dtypes, *, tm_target=512):
    """x: (M, K); weights[i]: (d_out_i, K); biases[i]: (d_out_i,).
    Returns [x @ w_i.T + b_i for i], reading x from HBM exactly once."""
    M, K = x.shape
    n = len(weights)
    limit = _vmem_limit_bytes()
    budget = int(limit * 0.75)

    def footprint(tm):
        f = 2 * tm * K * 4                                   # double-buffered f32 x tile
        for w, dt in zip(weights, out_dtypes):
            d_out = w.shape[0]
            f += 2 * d_out * K * 2                           # resident bf16 weight (2 bufs)
            f += 2 * tm * d_out * jnp.dtype(dt).itemsize     # double-buffered output
            f += tm * d_out * 4                              # f32 matmul result in flight
        return f

    target = tm_target
    tm = _pick_tile(M, target, 8)
    while target > 8 and footprint(tm) > budget:
        target //= 2
        tm = _pick_tile(M, target, 8)

    in_specs = [pl.BlockSpec((tm, K), lambda i: (i, 0))]
    args = [x]
    out_shapes, out_specs = [], []
    for w, b, dt in zip(weights, biases, out_dtypes):
        d_out = w.shape[0]
        in_specs.append(pl.BlockSpec((d_out, K), lambda i: (0, 0)))   # resident: fetched once
        in_specs.append(pl.BlockSpec((1, d_out), lambda i: (0, 0)))
        args.append(w.astype(jnp.bfloat16))
        args.append(b.reshape(1, d_out).astype(jnp.float32))
        out_shapes.append(jax.ShapeDtypeStruct((M, d_out), dt))
        out_specs.append(pl.BlockSpec((tm, d_out), lambda i: (i, 0)))

    kernel = functools.partial(_fused_proj_kernel, n_proj=n)
    cp = pltpu.CompilerParams(dimension_semantics=("parallel",),
                              vmem_limit_bytes=limit)
    if n == 1:
        out = pl.pallas_call(kernel, grid=(M // tm,), out_shape=out_shapes[0],
                             in_specs=in_specs, out_specs=out_specs[0],
                             compiler_params=cp)(*args)
        return [out]
    outs = pl.pallas_call(kernel, grid=(M // tm,), out_shape=tuple(out_shapes),
                          in_specs=in_specs, out_specs=tuple(out_specs),
                          compiler_params=cp)(*args)
    return list(outs)


# --------------------------- tiled linear fallback ---------------------------

def _linear_tiled_kernel(x_ref, w_ref, b_ref, o_ref, acc_ref):
    """One (tm, tn) output tile; grid axis 2 is the K reduction."""
    k = pl.program_id(2)

    @pl.when(k == 0)
    def _():
        acc_ref[...] = jnp.zeros_like(acc_ref)

    acc_ref[...] += lax.dot_general(
        x_ref[...].astype(jnp.bfloat16), w_ref[...],
        dimension_numbers=(((1,), (1,)), ((), ())),
        preferred_element_type=jnp.float32)

    @pl.when(k == pl.num_programs(2) - 1)
    def _():
        o_ref[...] = (acc_ref[...] + b_ref[...]).astype(o_ref.dtype)


def linear(x, w, b, out_dtype=jnp.float32, *, tm=512, tn=512, tk=1024):
    """nn.Linear: x @ w.T + b.  Weight-resident single-pass kernel whenever the
    bf16 weight fits comfortably in VMEM, tiled K-reduction otherwise."""
    M, K = x.shape
    d_out = w.shape[0]
    limit = _vmem_limit_bytes()
    if d_out * K * 2 <= limit // 4:
        return fused_projections(x, [w], [b], [out_dtype], tm_target=tm)[0]

    tm = _pick_tile(M, tm, 8)
    tn = _pick_tile(d_out, tn, 128)
    tk = _pick_tile(K, tk, 128)
    grid = (M // tm, d_out // tn, K // tk)
    return pl.pallas_call(
        _linear_tiled_kernel,
        out_shape=jax.ShapeDtypeStruct((M, d_out), out_dtype),
        grid_spec=pltpu.PrefetchScalarGridSpec(
            num_scalar_prefetch=0,
            grid=grid,
            in_specs=[
                pl.BlockSpec((tm, tk), lambda i, j, k: (i, k)),
                pl.BlockSpec((tn, tk), lambda i, j, k: (j, k)),
                pl.BlockSpec((1, tn), lambda i, j, k: (0, j)),
            ],
            out_specs=pl.BlockSpec((tm, tn), lambda i, j, k: (i, j)),
            scratch_shapes=[pltpu.VMEM((tm, tn), jnp.float32)],
        ),
        compiler_params=pltpu.CompilerParams(
            dimension_semantics=("parallel", "parallel", "arbitrary"),
            vmem_limit_bytes=limit),
    )(x, w.astype(jnp.bfloat16), b.reshape(1, d_out).astype(jnp.float32))


# ---------------------------- attention kernel -------------------------------

def _attention_kernel(q_ref, k_ref, v_ref, o_ref, w_ref, *, inv_nhead):
    """One (batch, L-tile, head-block) grid step.

    q_ref:        (tl, h_blk, d_k) bf16  (N axis squeezed; 1/sqrt(d_k) folded into Wq)
    k_ref, v_ref: (S,  h_blk, d_k) bf16
    o_ref:        (tl, h_blk, d_k) bf16  (single block store into (L,N,nhead,d_k))
    w_ref:        (tl, S) f32            (head-mean accumulator across grid axis 2)
    """
    h_step = pl.program_id(2)

    @pl.when(h_step == 0)
    def _():
        w_ref[...] = jnp.zeros_like(w_ref)

    # Rotate blocks head-major once so all heads run as one batched MXU matmul
    # (no per-head sublane-strided slicing).
    q = pltpu.einshape("lhd->hld", q_ref[...])    # (h_blk, tl, d_k)
    k = pltpu.einshape("shd->hsd", k_ref[...])    # (h_blk, S,  d_k)
    v = pltpu.einshape("shd->hsd", v_ref[...])    # (h_blk, S,  d_k)

    s = jnp.einsum("hld,hsd->hls", q, k,
                   preferred_element_type=jnp.float32)        # (h_blk, tl, S)
    m = jnp.max(s, axis=-1, keepdims=True)
    p = jnp.exp(s - m)
    denom = jnp.sum(p, axis=-1, keepdims=True)
    attn = p * pl.reciprocal(denom)               # exact: weights are user-visible

    o = jnp.einsum("hls,hsd->hld", attn.astype(jnp.bfloat16), v,
                   preferred_element_type=jnp.float32)        # (h_blk, tl, d_k)
    o_ref[...] = pltpu.einshape("hld->lhd", o.astype(o_ref.dtype))
    w_ref[...] += jnp.sum(attn, axis=0) * inv_nhead           # head-mean, accumulated in place


def scaled_dot_product_attention(q, k, v, nhead):
    """q: (L, N, nhead, d_k), k/v: (S, N, nhead, d_k), bf16 (scale pre-folded).

    Returns (out (L, N, nhead, d_k) bf16, weights (N, L, S) f32 head-averaged).
    """
    L, N, _, d_k = q.shape
    S = k.shape[0]
    limit = _vmem_limit_bytes()
    tl = _pick_tile(L, 256, 8)
    h_blk = _pick_head_block(nhead, tl, S, d_k, int(limit * 0.75))
    grid = (N, L // tl, nhead // h_blk)

    return pl.pallas_call(
        functools.partial(_attention_kernel, inv_nhead=1.0 / nhead),
        grid=grid,
        out_shape=(jax.ShapeDtypeStruct((L, N, nhead, d_k), jnp.bfloat16),
                   jax.ShapeDtypeStruct((N, L, S), jnp.float32)),
        in_specs=[
            pl.BlockSpec((tl, None, h_blk, d_k), lambda b, l, h: (l, b, h, 0)),
            pl.BlockSpec((S, None, h_blk, d_k), lambda b, l, h: (0, b, h, 0)),
            pl.BlockSpec((S, None, h_blk, d_k), lambda b, l, h: (0, b, h, 0)),
        ],
        out_specs=(
            pl.BlockSpec((tl, None, h_blk, d_k), lambda b, l, h: (l, b, h, 0)),
            pl.BlockSpec((None, tl, S), lambda b, l, h: (b, l, 0)),
        ),
        compiler_params=pltpu.CompilerParams(
            dimension_semantics=("parallel", "parallel", "arbitrary"),
            vmem_limit_bytes=limit),
    )(q, k, v)


# ------------------------------ module wrapper ------------------------------

def init_params(key, d_model):
    """Deterministic nn.Linear-style init (uniform +-1/sqrt(fan_in))."""
    bound = 1.0 / math.sqrt(d_model)
    names = ["q", "k", "v", "o"]
    keys = jax.random.split(key, 2 * len(names))
    params = {}
    for i, n in enumerate(names):
        params["w" + n] = jax.random.uniform(
            keys[2 * i], (d_model, d_model), jnp.float32, -bound, bound)
        params["b" + n] = jax.random.uniform(
            keys[2 * i + 1], (d_model,), jnp.float32, -bound, bound)
    return params


@functools.partial(jax.jit, static_argnames=("nhead", "fuse_qkv"))
def _mha_impl(query, key, value, params, *, nhead, fuse_qkv):
    L, N, E = query.shape
    S = key.shape[0]
    d_k = E // nhead
    scale = 1.0 / math.sqrt(d_k)

    # Fold the 1/sqrt(d_k) score scaling into the q projection (zero runtime cost).
    wq = params["wq"] * scale
    bq = params["bq"] * scale

    if fuse_qkv:
        # Self-attention: activations read from HBM once, all three weights resident.
        q, k, v = fused_projections(
            query.reshape(L * N, E),
            [wq, params["wk"], params["wv"]],
            [bq, params["bk"], params["bv"]],
            [jnp.bfloat16, jnp.bfloat16, jnp.bfloat16])
    else:
        q = linear(query.reshape(L * N, E), wq, bq, jnp.bfloat16)
        k = linear(key.reshape(S * N, E), params["wk"], params["bk"], jnp.bfloat16)
        v = linear(value.reshape(S * N, E), params["wv"], params["bv"], jnp.bfloat16)

    # Free views (no HBM transposes anywhere).
    q = q.reshape(L, N, nhead, d_k)
    k = k.reshape(S, N, nhead, d_k)
    v = v.reshape(S, N, nhead, d_k)

    attn_out, attn_weights = scaled_dot_product_attention(q, k, v, nhead)

    # attn_out is already in (L, N, nhead, d_k) == (L*N, E) layout: free reshape.
    out = linear(attn_out.reshape(L * N, E), params["wo"], params["bo"],
                 jnp.float32).reshape(L, N, E)
    # TODO(synk): train-mode dropout on the attention weights (eval = identity).
    return out, attn_weights


def multihead_attention(query, key, value, params, *, nhead):
    """query: (L, N, E), key/value: (S, N, E).

    Returns (output (L, N, E), attn_weights (N, L, S)) — same as the module.
    """
    # TODO(synk): optional attn_mask / key_padding_mask (reference default: None).
    fuse_qkv = (query is key) and (key is value)
    return _mha_impl(query, key, value, params, nhead=nhead, fuse_qkv=fuse_qkv)


# Pure-JAX f32 reference for a sanity check.
def _reference(query, key, value, params, nhead):
    L, N, E = query.shape
    S = key.shape[0]
    d_k = E // nhead
    NH = N * nhead

    def lin(x, w, b):
        return x @ w.T + b

    q = lin(query, params["wq"], params["bq"]).reshape(L, NH, d_k).transpose(1, 0, 2)
    k = lin(key, params["wk"], params["bk"]).reshape(S, NH, d_k).transpose(1, 0, 2)
    v = lin(value, params["wv"], params["bv"]).reshape(S, NH, d_k).transpose(1, 0, 2)
    s = jnp.einsum("hld,hsd->hls", q, k) / math.sqrt(d_k)
    a = jax.nn.softmax(s, axis=-1)
    o = jnp.einsum("hls,hsd->hld", a, v).transpose(1, 0, 2).reshape(L, N, E)
    o = lin(o, params["wo"], params["bo"])
    return o, a.reshape(N, nhead, L, S).mean(axis=1)


if __name__ == "__main__":
    d_model, nhead = 32, 4
    L, S, N = 8, 16, 2

    root = jax.random.PRNGKey(0)
    kq, kk, kv, kp, kx = jax.random.split(root, 5)
    params = init_params(kp, d_model)

    # --- self-attention (fused QKV projection path) ---
    x = jax.random.normal(kx, (L, N, d_model), jnp.float32)
    out_s, w_s = multihead_attention(x, x, x, params, nhead=nhead)
    jax.block_until_ready((out_s, w_s))
    ref_out_s, ref_w_s = _reference(x, x, x, params, nhead)
    assert out_s.shape == (L, N, d_model) and w_s.shape == (N, L, L)
    assert jnp.allclose(out_s, ref_out_s, rtol=5e-2, atol=5e-2), \
        float(jnp.max(jnp.abs(out_s - ref_out_s)))
    assert jnp.allclose(w_s, ref_w_s, rtol=5e-2, atol=5e-2), \
        float(jnp.max(jnp.abs(w_s - ref_w_s)))

    # --- cross-attention (separate projections, S != L) ---
    query = jax.random.normal(kq, (L, N, d_model), jnp.float32)
    key = jax.random.normal(kk, (S, N, d_model), jnp.float32)
    value = jax.random.normal(kv, (S, N, d_model), jnp.float32)
    out_c, w_c = multihead_attention(query, key, value, params, nhead=nhead)
    jax.block_until_ready((out_c, w_c))
    ref_out_c, ref_w_c = _reference(query, key, value, params, nhead)
    assert out_c.shape == (L, N, d_model) and w_c.shape == (N, L, S)
    assert jnp.allclose(out_c, ref_out_c, rtol=5e-2, atol=5e-2), \
        float(jnp.max(jnp.abs(out_c - ref_out_c)))
    assert jnp.allclose(w_c, ref_w_c, rtol=5e-2, atol=5e-2), \
        float(jnp.max(jnp.abs(w_c - ref_w_c)))

    print("KERNEL_OK")
</pallas_src>

<mosaic_0001>
module attributes {stable_mosaic.version = 11 : i64} {
  func.func @_fused_proj_kernel(%arg0: i32, %arg1: memref<16x32xf32, #tpu.memory_space<vmem>>, %arg2: memref<32x32xbf16, #tpu.memory_space<vmem>>, %arg3: memref<1x32xf32, #tpu.memory_space<vmem>>, %arg4: memref<32x32xbf16, #tpu.memory_space<vmem>>, %arg5: memref<1x32xf32, #tpu.memory_space<vmem>>, %arg6: memref<32x32xbf16, #tpu.memory_space<vmem>>, %arg7: memref<1x32xf32, #tpu.memory_space<vmem>>, %arg8: memref<16x32xbf16, #tpu.memory_space<vmem>>, %arg9: memref<16x32xbf16, #tpu.memory_space<vmem>>, %arg10: memref<16x32xbf16, #tpu.memory_space<vmem>>) attributes {dimension_semantics = [#tpu.dimension_semantics<parallel>], iteration_bounds = array<i64: 1>, scalar_prefetch = 0 : i64, scratch_operands = 0 : i64, tpu.core_type = #tpu.core_type<tc>, window_params = [{transform_indices = @transform_0, window_bounds = array<i64: 16, 32>}, {pipeline_mode = #tpu.pipeline_mode<synchronous>, transform_indices = @transform_1, window_bounds = array<i64: 32, 32>}, {pipeline_mode = #tpu.pipeline_mode<synchronous>, transform_indices = @transform_2, window_bounds = array<i64: 1, 32>}, {pipeline_mode = #tpu.pipeline_mode<synchronous>, transform_indices = @transform_3, window_bounds = array<i64: 32, 32>}, {pipeline_mode = #tpu.pipeline_mode<synchronous>, transform_indices = @transform_4, window_bounds = array<i64: 1, 32>}, {pipeline_mode = #tpu.pipeline_mode<synchronous>, transform_indices = @transform_5, window_bounds = array<i64: 32, 32>}, {pipeline_mode = #tpu.pipeline_mode<synchronous>, transform_indices = @transform_6, window_bounds = array<i64: 1, 32>}, {transform_indices = @transform_7, window_bounds = array<i64: 16, 32>}, {transform_indices = @transform_8, window_bounds = array<i64: 16, 32>}, {transform_indices = @transform_9, window_bounds = array<i64: 16, 32>}]} {
    %c0 = arith.constant 0 : index
    %c0_0 = arith.constant 0 : index
    %0 = vector.load %arg1[%c0, %c0_0] : memref<16x32xf32, #tpu.memory_space<vmem>>, vector<16x32xf32>
    %1 = arith.truncf %0 : vector<16x32xf32> to vector<16x32xbf16>
    %c0_1 = arith.constant 0 : index
    %c0_2 = arith.constant 0 : index
    %2 = vector.load %arg2[%c0_1, %c0_2] : memref<32x32xbf16, #tpu.memory_space<vmem>>, vector<32x32xbf16>
    %cst = arith.constant dense<0.000000e+00> : vector<16x32xf32>
    %3 = tpu.matmul %1, %2, %cst {dimension_numbers = #tpu.dot_dimension_numbers<[1], [1], [0], [0], [0, 0, 1, 0], [], []>} : vector<16x32xbf16>, vector<32x32xbf16>, vector<16x32xf32> -> vector<16x32xf32>
    %c0_3 = arith.constant 0 : index
    %c0_4 = arith.constant 0 : index
    %4 = vector.load %arg3[%c0_3, %c0_4] : memref<1x32xf32, #tpu.memory_space<vmem>>, vector<1x32xf32>
    %5 = vector.broadcast %4 : vector<1x32xf32> to vector<16x32xf32>
    %6 = arith.addf %3, %5 : vector<16x32xf32>
    %7 = arith.truncf %6 : vector<16x32xf32> to vector<16x32xbf16>
    %c0_5 = arith.constant 0 : index
    %c0_6 = arith.constant 0 : index
    %8 = vector.load %arg8[%c0_5, %c0_6] : memref<16x32xbf16, #tpu.memory_space<vmem>>, vector<16x32xbf16>
    tpu.vector_store %arg8[%c0_5, %c0_6], %7 {strides = array<i32>} : memref<16x32xbf16, #tpu.memory_space<vmem>>, vector<16x32xbf16>,
    %c0_7 = arith.constant 0 : index
    %c0_8 = arith.constant 0 : index
    %9 = vector.load %arg4[%c0_7, %c0_8] : memref<32x32xbf16, #tpu.memory_space<vmem>>, vector<32x32xbf16>
    %cst_9 = arith.constant dense<0.000000e+00> : vector<16x32xf32>
    %10 = tpu.matmul %1, %9, %cst_9 {dimension_numbers = #tpu.dot_dimension_numbers<[1], [1], [0], [0], [0, 0, 1, 0], [], []>} : vector<16x32xbf16>, vector<32x32xbf16>, vector<16x32xf32> -> vector<16x32xf32>
    %c0_10 = arith.constant 0 : index
    %c0_11 = arith.constant 0 : index
    %11 = vector.load %arg5[%c0_10, %c0_11] : memref<1x32xf32, #tpu.memory_space<vmem>>, vector<1x32xf32>
    %12 = vector.broadcast %11 : vector<1x32xf32> to vector<16x32xf32>
    %13 = arith.addf %10, %12 : vector<16x32xf32>
    %14 = arith.truncf %13 : vector<16x32xf32> to vector<16x32xbf16>
    %c0_12 = arith.constant 0 : index
    %c0_13 = arith.constant 0 : index
    %15 = vector.load %arg9[%c0_12, %c0_13] : memref<16x32xbf16, #tpu.memory_space<vmem>>, vector<16x32xbf16>
    tpu.vector_store %arg9[%c0_12, %c0_13], %14 {strides = array<i32>} : memref<16x32xbf16, #tpu.memory_space<vmem>>, vector<16x32xbf16>,
    %c0_14 = arith.constant 0 : index
    %c0_15 = arith.constant 0 : index
    %16 = vector.load %arg6[%c0_14, %c0_15] : memref<32x32xbf16, #tpu.memory_space<vmem>>, vector<32x32xbf16>
    %cst_16 = arith.constant dense<0.000000e+00> : vector<16x32xf32>
    %17 = tpu.matmul %1, %16, %cst_16 {dimension_numbers = #tpu.dot_dimension_numbers<[1], [1], [0], [0], [0, 0, 1, 0], [], []>} : vector<16x32xbf16>, vector<32x32xbf16>, vector<16x32xf32> -> vector<16x32xf32>
    %c0_17 = arith.constant 0 : index
    %c0_18 = arith.constant 0 : index
    %18 = vector.load %arg7[%c0_17, %c0_18] : memref<1x32xf32, #tpu.memory_space<vmem>>, vector<1x32xf32>
    %19 = vector.broadcast %18 : vector<1x32xf32> to vector<16x32xf32>
    %20 = arith.addf %17, %19 : vector<16x32xf32>
    %21 = arith.truncf %20 : vector<16x32xf32> to vector<16x32xbf16>
    %c0_19 = arith.constant 0 : index
    %c0_20 = arith.constant 0 : index
    %22 = vector.load %arg10[%c0_19, %c0_20] : memref<16x32xbf16, #tpu.memory_space<vmem>>, vector<16x32xbf16>
    tpu.vector_store %arg10[%c0_19, %c0_20], %21 {strides = array<i32>} : memref<16x32xbf16, #tpu.memory_space<vmem>>, vector<16x32xbf16>,
    return
  }
  func.func @transform_0(%arg0: i32) -> (i32, i32) {
    %c0_i32 = arith.constant 0 : i32
    %c0_i32_0 = arith.constant 0 : i32
    return %arg0, %c0_i32 : i32, i32
  }
  func.func @transform_1(%arg0: i32) -> (i32, i32) {
    %c0_i32 = arith.constant 0 : i32
    %c0_i32_0 = arith.constant 0 : i32
    %c0_i32_1 = arith.constant 0 : i32
    return %c0_i32, %c0_i32_0 : i32, i32
  }
  func.func @transform_2(%arg0: i32) -> (i32, i32) {
    %c0_i32 = arith.constant 0 : i32
    %c0_i32_0 = arith.constant 0 : i32
    %c0_i32_1 = arith.constant 0 : i32
    return %c0_i32, %c0_i32_0 : i32, i32
  }
  func.func @transform_3(%arg0: i32) -> (i32, i32) {
    %c0_i32 = arith.constant 0 : i32
    %c0_i32_0 = arith.constant 0 : i32
    %c0_i32_1 = arith.constant 0 : i32
    return %c0_i32, %c0_i32_0 : i32, i32
  }
  func.func @transform_4(%arg0: i32) -> (i32, i32) {
    %c0_i32 = arith.constant 0 : i32
    %c0_i32_0 = arith.constant 0 : i32
    %c0_i32_1 = arith.constant 0 : i32
    return %c0_i32, %c0_i32_0 : i32, i32
  }
  func.func @transform_5(%arg0: i32) -> (i32, i32) {
    %c0_i32 = arith.constant 0 : i32
    %c0_i32_0 = arith.constant 0 : i32
    %c0_i32_1 = arith.constant 0 : i32
    return %c0_i32, %c0_i32_0 : i32, i32
  }
  func.func @transform_6(%arg0: i32) -> (i32, i32) {
    %c0_i32 = arith.constant 0 : i32
    %c0_i32_0 = arith.constant 0 : i32
    %c0_i32_1 = arith.constant 0 : i32
    return %c0_i32, %c0_i32_0 : i32, i32
  }
  func.func @transform_7(%arg0: i32) -> (i32, i32) {
    %c0_i32 = arith.constant 0 : i32
    %c0_i32_0 = arith.constant 0 : i32
    return %arg0, %c0_i32 : i32, i32
  }
  func.func @transform_8(%arg0: i32) -> (i32, i32) {
    %c0_i32 = arith.constant 0 : i32
    %c0_i32_0 = arith.constant 0 : i32
    return %arg0, %c0_i32 : i32, i32
  }
  func.func @transform_9(%arg0: i32) -> (i32, i32) {
    %c0_i32 = arith.constant 0 : i32
    %c0_i32_0 = arith.constant 0 : i32
    return %arg0, %c0_i32 : i32, i32
  }
}

module attributes {stable_mosaic.version = 11 : i64} {
  func.func @_fused_proj_kernel(%arg0: i32, %arg1: memref<16x32xbf16, #tpu.memory_space<vmem>>, %arg2: memref<32x32xbf16, #tpu.memory_space<vmem>>, %arg3: memref<1x32xf32, #tpu.memory_space<vmem>>, %arg4: memref<16x32xf32, #tpu.memory_space<vmem>>) attributes {dimension_semantics = [#tpu.dimension_semantics<parallel>], iteration_bounds = array<i64: 1>, scalar_prefetch = 0 : i64, scratch_operands = 0 : i64, tpu.core_type = #tpu.core_type<tc>, window_params = [{transform_indices = @transform_0, window_bounds = array<i64: 16, 32>}, {pipeline_mode = #tpu.pipeline_mode<synchronous>, transform_indices = @transform_1, window_bounds = array<i64: 32, 32>}, {pipeline_mode = #tpu.pipeline_mode<synchronous>, transform_indices = @transform_2, window_bounds = array<i64: 1, 32>}, {transform_indices = @transform_3, window_bounds = array<i64: 16, 32>}]} {
    %c0 = arith.constant 0 : index
    %c0_0 = arith.constant 0 : index
    %0 = vector.load %arg1[%c0, %c0_0] : memref<16x32xbf16, #tpu.memory_space<vmem>>, vector<16x32xbf16>
    %c0_1 = arith.constant 0 : index
    %c0_2 = arith.constant 0 : index
    %1 = vector.load %arg2[%c0_1, %c0_2] : memref<32x32xbf16, #tpu.memory_space<vmem>>, vector<32x32xbf16>
    %cst = arith.constant dense<0.000000e+00> : vector<16x32xf32>
    %2 = tpu.matmul %0, %1, %cst {dimension_numbers = #tpu.dot_dimension_numbers<[1], [1], [0], [0], [0, 0, 1, 0], [], []>} : vector<16x32xbf16>, vector<32x32xbf16>, vector<16x32xf32> -> vector<16x32xf32>
    %c0_3 = arith.constant 0 : index
    %c0_4 = arith.constant 0 : index
    %3 = vector.load %arg3[%c0_3, %c0_4] : memref<1x32xf32, #tpu.memory_space<vmem>>, vector<1x32xf32>
    %4 = vector.broadcast %3 : vector<1x32xf32> to vector<16x32xf32>
    %5 = arith.addf %2, %4 : vector<16x32xf32>
    %c0_5 = arith.constant 0 : index
    %c0_6 = arith.constant 0 : index
    %6 = vector.load %arg4[%c0_5, %c0_6] : memref<16x32xf32, #tpu.memory_space<vmem>>, vector<16x32xf32>
    tpu.vector_store %arg4[%c0_5, %c0_6], %5 {strides = array<i32>} : memref<16x32xf32, #tpu.memory_space<vmem>>, vector<16x32xf32>,
    return
  }
  func.func @transform_0(%arg0: i32) -> (i32, i32) {
    %c0_i32 = arith.constant 0 : i32
    %c0_i32_0 = arith.constant 0 : i32
    return %arg0, %c0_i32 : i32, i32
  }
  func.func @transform_1(%arg0: i32) -> (i32, i32) {
    %c0_i32 = arith.constant 0 : i32
    %c0_i32_0 = arith.constant 0 : i32
    %c0_i32_1 = arith.constant 0 : i32
    return %c0_i32, %c0_i32_0 : i32, i32
  }
  func.func @transform_2(%arg0: i32) -> (i32, i32) {
    %c0_i32 = arith.constant 0 : i32
    %c0_i32_0 = arith.constant 0 : i32
    %c0_i32_1 = arith.constant 0 : i32
    return %c0_i32, %c0_i32_0 : i32, i32
  }
  func.func @transform_3(%arg0: i32) -> (i32, i32) {
    %c0_i32 = arith.constant 0 : i32
    %c0_i32_0 = arith.constant 0 : i32
    return %arg0, %c0_i32 : i32, i32
  }
}

module attributes {stable_mosaic.version = 11 : i64} {
  func.func @_attention_kernel(%arg0: i32, %arg1: i32, %arg2: i32, %arg3: memref<8x1x4x8xbf16, #tpu.memory_space<vmem>>, %arg4: memref<8x1x4x8xbf16, #tpu.memory_space<vmem>>, %arg5: memref<8x1x4x8xbf16, #tpu.memory_space<vmem>>, %arg6: memref<8x1x4x8xbf16, #tpu.memory_space<vmem>>, %arg7: memref<1x8x8xf32, #tpu.memory_space<vmem>>) attributes {dimension_semantics = [#tpu.dimension_semantics<parallel>, #tpu.dimension_semantics<parallel>, #tpu.dimension_semantics<arbitrary>], iteration_bounds = array<i64: 2, 1, 1>, scalar_prefetch = 0 : i64, scratch_operands = 0 : i64, tpu.core_type = #tpu.core_type<tc>, window_params = [{transform_indices = @transform_0, window_bounds = array<i64: 8, 1, 4, 8>}, {transform_indices = @transform_1, window_bounds = array<i64: 8, 1, 4, 8>}, {transform_indices = @transform_2, window_bounds = array<i64: 8, 1, 4, 8>}, {transform_indices = @transform_3, window_bounds = array<i64: 8, 1, 4, 8>}, {transform_indices = @transform_4, window_bounds = array<i64: 1, 8, 8>}]} {
    %c0_i32 = arith.constant 0 : i32
    %0 = arith.cmpi eq, %arg2, %c0_i32 : i32
    %1 = arith.extui %0 : i1 to i32
    %c0_i32_0 = arith.constant 0 : i32
    %2 = arith.cmpi ne, %1, %c0_i32_0 : i32
    scf.if %2 {
      %cst_27 = arith.constant 0.000000e+00 : f32
      %39 = vector.broadcast %cst_27 : f32 to vector<8x8xf32>
      %c0_28 = arith.constant 0 : index
      %c0_29 = arith.constant 0 : index
      %c0_30 = arith.constant 0 : index
      %40 = vector.load %arg7[%c0_28, %c0_29, %c0_30] : memref<1x8x8xf32, #tpu.memory_space<vmem>>, vector<1x8x8xf32>
      %41 = vector.shape_cast %40 : vector<1x8x8xf32> to vector<8x8xf32>
      %42 = vector.shape_cast %39 : vector<8x8xf32> to vector<1x8x8xf32>
      tpu.vector_store %arg7[%c0_28, %c0_29, %c0_30], %42 {strides = array<i32>} : memref<1x8x8xf32, #tpu.memory_space<vmem>>, vector<1x8x8xf32>,
    } else {
    }
    %c0 = arith.constant 0 : index
    %c0_1 = arith.constant 0 : index
    %c0_2 = arith.constant 0 : index
    %c0_3 = arith.constant 0 : index
    %3 = vector.load %arg3[%c0, %c0_1, %c0_2, %c0_3] : memref<8x1x4x8xbf16, #tpu.memory_space<vmem>>, vector<8x1x4x8xbf16>
    %4 = vector.shape_cast %3 : vector<8x1x4x8xbf16> to vector<8x4x8xbf16>
    %5 = tpu.transpose %4, [1, 0, 2] : vector<8x4x8xbf16> -> vector<4x8x8xbf16>
    %c0_4 = arith.constant 0 : index
    %c0_5 = arith.constant 0 : index
    %c0_6 = arith.constant 0 : index
    %c0_7 = arith.constant 0 : index
    %6 = vector.load %arg4[%c0_4, %c0_5, %c0_6, %c0_7] : memref<8x1x4x8xbf16, #tpu.memory_space<vmem>>, vector<8x1x4x8xbf16>
    %7 = vector.shape_cast %6 : vector<8x1x4x8xbf16> to vector<8x4x8xbf16>
    %8 = tpu.transpose %7, [1, 0, 2] : vector<8x4x8xbf16> -> vector<4x8x8xbf16>
    %c0_8 = arith.constant 0 : index
    %c0_9 = arith.constant 0 : index
    %c0_10 = arith.constant 0 : index
    %c0_11 = arith.constant 0 : index
    %9 = vector.load %arg5[%c0_8, %c0_9, %c0_10, %c0_11] : memref<8x1x4x8xbf16, #tpu.memory_space<vmem>>, vector<8x1x4x8xbf16>
    %10 = vector.shape_cast %9 : vector<8x1x4x8xbf16> to vector<8x4x8xbf16>
    %11 = tpu.transpose %10, [1, 0, 2] : vector<8x4x8xbf16> -> vector<4x8x8xbf16>
    "tpu.trace_start"() <{level = 10 : i32, message = "hld,hsd->hls"}> : () -> ()
    %cst = arith.constant dense<0.000000e+00> : vector<4x8x8xf32>
    %12 = tpu.matmul %5, %8, %cst {dimension_numbers = #tpu.dot_dimension_numbers<[2], [2], [1], [1], [0, 0, 0, 1, 1, 1], [0], [0]>} : vector<4x8x8xbf16>, vector<4x8x8xbf16>, vector<4x8x8xf32> -> vector<4x8x8xf32>
    "tpu.trace_stop"() : () -> ()
    %cst_12 = arith.constant dense<0xFF800000> : vector<4x8xf32>
    %13 = vector.multi_reduction <maximumf>, %12, %cst_12 [2] : vector<4x8x8xf32> to vector<4x8xf32>
    %14 = vector.shape_cast %13 : vector<4x8xf32> to vector<4x8x1xf32>
    %15 = vector.broadcast %14 : vector<4x8x1xf32> to vector<4x8x8xf32>
    %16 = arith.subf %12, %15 : vector<4x8x8xf32>
    %17 = math.exp %16 : vector<4x8x8xf32>
    %cst_13 = arith.constant dense<0.000000e+00> : vector<4x8xf32>
    %18 = vector.multi_reduction <add>, %17, %cst_13 [2] : vector<4x8x8xf32> to vector<4x8xf32>
    %19 = vector.shape_cast %18 : vector<4x8xf32> to vector<4x8x1xf32>
    %20 = tpu.reciprocal %19 : vector<4x8x1xf32> -> vector<4x8x1xf32>
    %21 = vector.broadcast %20 : vector<4x8x1xf32> to vector<4x8x8xf32>
    %22 = arith.mulf %17, %21 : vector<4x8x8xf32>
    %23 = arith.truncf %22 : vector<4x8x8xf32> to vector<4x8x8xbf16>
    "tpu.trace_start"() <{level = 10 : i32, message = "hls,hsd->hld"}> : () -> ()
    %cst_14 = arith.constant dense<0.000000e+00> : vector<4x8x8xf32>
    %24 = tpu.matmul %23, %11, %cst_14 {dimension_numbers = #tpu.dot_dimension_numbers<[2], [1], [1], [2], [0, 0, 0, 1, 1, 2], [0], [0]>} : vector<4x8x8xbf16>, vector<4x8x8xbf16>, vector<4x8x8xf32> -> vector<4x8x8xf32>
    "tpu.trace_stop"() : () -> ()
    %25 = arith.truncf %24 : vector<4x8x8xf32> to vector<4x8x8xbf16>
    %26 = tpu.transpose %25, [1, 0, 2] : vector<4x8x8xbf16> -> vector<8x4x8xbf16>
    %c0_15 = arith.constant 0 : index
    %c0_16 = arith.constant 0 : index
    %c0_17 = arith.constant 0 : index
    %c0_18 = arith.constant 0 : index
    %27 = vector.load %arg6[%c0_15, %c0_16, %c0_17, %c0_18] : memref<8x1x4x8xbf16, #tpu.memory_space<vmem>>, vector<8x1x4x8xbf16>
    %28 = vector.shape_cast %27 : vector<8x1x4x8xbf16> to vector<8x4x8xbf16>
    %29 = vector.shape_cast %26 : vector<8x4x8xbf16> to vector<8x1x4x8xbf16>
    tpu.vector_store %arg6[%c0_15, %c0_16, %c0_17, %c0_18], %29 {strides = array<i32>} : memref<8x1x4x8xbf16, #tpu.memory_space<vmem>>, vector<8x1x4x8xbf16>,
    %c0_19 = arith.constant 0 : index
    %c0_20 = arith.constant 0 : index
    %c0_21 = arith.constant 0 : index
    %30 = vector.load %arg7[%c0_19, %c0_20, %c0_21] : memref<1x8x8xf32, #tpu.memory_space<vmem>>, vector<1x8x8xf32>
    %31 = vector.shape_cast %30 : vector<1x8x8xf32> to vector<8x8xf32>
    %cst_22 = arith.constant dense<0.000000e+00> : vector<8x8xf32>
    %32 = vector.multi_reduction <add>, %22, %cst_22 [0] : vector<4x8x8xf32> to vector<8x8xf32>
    %cst_23 = arith.constant 2.500000e-01 : f32
    %33 = vector.broadcast %cst_23 : f32 to vector<8x8xf32>
    %34 = arith.mulf %32, %33 : vector<8x8xf32>
    %35 = arith.addf %31, %34 : vector<8x8xf32>
    %c0_24 = arith.constant 0 : index
    %c0_25 = arith.constant 0 : index
    %c0_26 = arith.constant 0 : index
    %36 = vector.load %arg7[%c0_24, %c0_25, %c0_26] : memref<1x8x8xf32, #tpu.memory_space<vmem>>, vector<1x8x8xf32>
    %37 = vector.shape_cast %36 : vector<1x8x8xf32> to vector<8x8xf32>
    %38 = vector.shape_cast %35 : vector<8x8xf32> to vector<1x8x8xf32>
    tpu.vector_store %arg7[%c0_24, %c0_25, %c0_26], %38 {strides = array<i32>} : memref<1x8x8xf32, #tpu.memory_space<vmem>>, vector<1x8x8xf32>,
    return
  }
  func.func @transform_0(%arg0: i32, %arg1: i32, %arg2: i32) -> (i32, i32, i32, i32) {
    %c0_i32 = arith.constant 0 : i32
    %c0_i32_0 = arith.constant 0 : i32
    return %arg1, %arg0, %arg2, %c0_i32 : i32, i32, i32, i32
  }
  func.func @transform_1(%arg0: i32, %arg1: i32, %arg2: i32) -> (i32, i32, i32, i32) {
    %c0_i32 = arith.constant 0 : i32
    %c0_i32_0 = arith.constant 0 : i32
    %c0_i32_1 = arith.constant 0 : i32
    return %c0_i32, %arg0, %arg2, %c0_i32_0 : i32, i32, i32, i32
  }
  func.func @transform_2(%arg0: i32, %arg1: i32, %arg2: i32) -> (i32, i32, i32, i32) {
    %c0_i32 = arith.constant 0 : i32
    %c0_i32_0 = arith.constant 0 : i32
    %c0_i32_1 = arith.constant 0 : i32
    return %c0_i32, %arg0, %arg2, %c0_i32_0 : i32, i32, i32, i32
  }
  func.func @transform_3(%arg0: i32, %arg1: i32, %arg2: i32) -> (i32, i32, i32, i32) {
    %c0_i32 = arith.constant 0 : i32
    %c0_i32_0 = arith.constant 0 : i32
    return %arg1, %arg0, %arg2, %c0_i32 : i32, i32, i32, i32
  }
  func.func @transform_4(%arg0: i32, %arg1: i32, %arg2: i32) -> (i32, i32, i32) {
    %c0_i32 = arith.constant 0 : i32
    %c0_i32_0 = arith.constant 0 : i32
    return %arg0, %arg1, %c0_i32 : i32, i32, i32
  }
}

</mosaic_0001>

<bundles_post_ra>
// kernel: _mha_impl.5
= control target key start
LH: loop header
LB: loop body
LE: loop exit
PB: predicated region body
PF: predicated region fallthrough
CT: control target
= control target key end

     0   :  { %v161_v1 = vmov 0.0   ;;  %vm44_vm0 = vcmask 261120   ;;  %vm162_vm1 = vmmov 0   ;;  %s215_s0 = inlined_call_operand.vmem [shape: bf16[16,32], index: 0, kind: input, shape index: {}]   ;;  %s216_s1 = inlined_call_operand.vmem [shape: bf16[32,32], index: 1, kind: input, shape index: {}]   ;;  %s217_s2 = inlined_call_operand.vmem [shape: f32[1,32], index: 2, kind: input, shape index: {}]   ;;  %s218_s3 = inlined_call_operand.hbm [shape: f32[16,32], index: 3, kind: output, shape index: {}]  }
   0x1   :  { %v134_v0 = vld [vmem:[%s216_s1] sm:$0xff]   ;;  %121 = vmatprep.subr.bf16.mxu0 %v161_v1  ;;  %125 = vmatprep.mubr.msk.bf16.mxu0 %vm162_vm1, %v161_v1 }
   0x2   :  { %v49_v2 = vsel %vm44_vm0, %v134_v0, 0 }
   0x3   :  { %122 = vmatpush3.bf16.xpose.msra.mxu0 %v49_v2 }
   0x4   :  { %8 = vsyncpa [#allocation3], 0  ;;  %123 = vmatprep.subr.bf16.mxu0 %v161_v1  ;;  %v135_v3 = vld [vmem:[%s216_s1 + $0x8] sm:$0xff]   ;;  %v136_v5 = vld [vmem:[%s215_s0] sm:$0xff]   ;;  %s163_s20 = smov [#allocation2]  }
   0x5   :  { %v52_v4 = vsel %vm44_vm0, %v135_v3, 0  ;;  %v113_v6 = vld [vmem:[%s217_s2] ss:$0 sm:$0xff]  ;;  %s102_s21 = sshll.u32 %s163_s20, 4  ;;  %s103_s21 = int_to_ptr.vmem [resolvable:$true] %s102_s21 }
   0x6   :  { %s137_s0 = scalar_lea.vmem %s103_s21, 256  ;;  %p142_p1 = scmp.lt.s32.totalorder %s103_s21, %s103_s21 }
   0x7   :  { %p138_p0 = scmp.ne.s32.totalorder %s103_s21, %s137_s0  ;;  %p143_p2 = scmp.lt.s32.totalorder %s137_s0, %s137_s0 }
   0x9   :  { %p144_p3 = por %p143_p2, %p142_p1 }
   0xb   :  { %124 = vmatpush3.bf16.xpose.msra.mxu0 %v52_v4  ;;  %p145_p4 = pnand %p144_p3, %p138_p0 }
  0x12   :  { %126 = vmatmul.mubr.msk.bf16.vlgmr.msra.gmra.mrb[0].mxu0 %vm44_vm0, %v136_v5 }
  0xe5   :  { %v88_v7 = vpop.f32.mrb[0].mxu0 }
  0xe6   :  { %v89_v8 = vadd.f32 %v113_v6, %v88_v7  ;;  %v127_v9 = vpop.f32.mrb[1].mxu0 }
  0xe7   :  { %v91_v10 = vpop.f32.mrb[2].mxu0 }
  0xe8   :  { %95 = vst.msk [vmem:[#allocation2] sm:$0xff] %vm44_vm0, %v89_v8  ;;  %v92_v11 = vadd.f32 %v113_v6, %v91_v10  ;;  %v128_v12 = vpop.f32.mrb[3].mxu0 }
  0xea   :  { %96 = vst.msk [vmem:[#allocation2 + $0x8] sm:$0xff] %vm44_vm0, %v92_v11 }
  0xeb   :  { %148 = shalt.err (!%p145_p4)
}
  0xec   :  { %s149_s22 = scalar_lea.hbm %s218_s3, 256 }
  0xed   :  { %p150_p5 = scmp.ne.s32.totalorder %s218_s3, %s149_s22  ;;  %p153_p6 = scmp.lt.u32.totalorder %s149_s22, %s218_s3 }
  0xef   :  { %p155_p7 = pnand %p153_p6, %p150_p5 }
  0xf1   :  { %158 = shalt.err (!%p155_p7)
}
  0xf2   :  { %s164_s27 = smov 128   ;;  %s165_s28 = smov 8  }
  0xf3   :  { %108 = dma.vmem_to_hbm [thread:$0]  %s103_s21, 256, %s218_s3, [#allocation3], %s164_s27, %s164_s27, %s165_s28  }
  0xf4   :  { %159 = dma.done.wait [#allocation3], 256  }
  0xf5   :  { %160 = vsyncadd [#allocation3], 4294967040 }
  0xf6   :  { %112 = vsyncpa [#allocation3], 1 }

// kernel: _mha_impl.3
= control target key start
LH: loop header
LB: loop body
LE: loop exit
PB: predicated region body
PF: predicated region fallthrough
CT: control target
= control target key end

     0   :  { %vm54_vm0 = vcmask 261120   ;;  %v349_v0 = vmov 0.0   ;;  %vm350_vm1 = vmmov 0   ;;  %vm113_vm2 = vcmask 257024   ;;  %s470_s1 = inlined_call_operand.vmem [shape: bf16[32,32], index: 1, kind: input, shape index: {}]   ;;  %s471_s3 = inlined_call_operand.vmem [shape: bf16[32,32], index: 3, kind: input, shape index: {}]   ;;  %s472_s5 = inlined_call_operand.vmem [shape: bf16[32,32], index: 5, kind: input, shape index: {}]   ;;  %s473_s0 = inlined_call_operand.vmem [shape: f32[16,32], index: 0, kind: input, shape index: {}]   ;;  %s474_s2 = inlined_call_operand.vmem [shape: f32[1,32], index: 2, kind: input, shape index: {}]   ;;  %s475_s4 = inlined_call_operand.vmem [shape: f32[1,32], index: 4, kind: input, shape index: {}]   ;;  %s476_s7 = inlined_call_operand.vmem [shape: bf16[16,32], index: 7, kind: output, shape index: {0}]   ;;  %s477_s8 = inlined_call_operand.vmem [shape: bf16[16,32], index: 8, kind: output, shape index: {1}]   ;;  %s478_s6 = inlined_call_operand.vmem [shape: f32[1,32], index: 6, kind: input, shape index: {}]   ;;  %s479_s9 = inlined_call_operand.vmem [shape: bf16[16,32], index: 9, kind: output, shape index: {2}]  }
   0x1   :  { %317 = vmatprep.subr.bf16.mxu0 %v349_v0  ;;  %v343_v1 = vld [vmem:[%s470_s1] sm:$0xff]   ;;  %325 = vmatprep.subr.bf16.mxu1 %v349_v0  ;;  %v344_v4 = vld [vmem:[%s470_s1 + $0x8] sm:$0xff]  }
   0x2   :  { %321 = vmatprep.mubr.msk.bf16.mxu0 %vm350_vm1, %v349_v0  ;;  %329 = vmatprep.mubr.msk.bf16.mxu1 %vm350_vm1, %v349_v0  ;;  %v59_v2 = vsel %vm54_vm0, %v343_v1, 0  ;;  %v345_v3 = vld [vmem:[%s471_s3] sm:$0xff]   ;;  %v347_v6 = vld [vmem:[%s471_s3 + $0x8] sm:$0xff]   ;;  %v62_v7 = vsel %vm54_vm0, %v344_v4, 0 }
   0x3   :  { %318 = vmatpush3.bf16.xpose.msra.mxu0 %v59_v2  ;;  %v138_v5 = vsel %vm54_vm0, %v345_v3, 0  ;;  %v141_v8 = vsel %vm54_vm0, %v347_v6, 0  ;;  %v30_v9 = vld [vmem:[%s473_s0] sm:$0xff]  ;;  %v31_v10 = vld [vmem:[%s473_s0 + $0x8] sm:$0xff] }
   0x4   :  { %319 = vmatprep.subr.bf16.mxu0 %v349_v0  ;;  %326 = vmatpush3.bf16.xpose.msra.mxu1 %v138_v5  ;;  %v346_v11 = vld [vmem:[%s472_s5] sm:$0xff]   ;;  %v32_v12 = vpack.c.bf16 %v31_v10, %v30_v9  ;;  %v348_v14 = vld [vmem:[%s472_s5 + $0x8] sm:$0xff]  }
   0x5   :  { %327 = vmatprep.subr.bf16.mxu1 %v349_v0  ;;  %v216_v13 = vsel %vm54_vm0, %v346_v11, 0  ;;  %v219_v15 = vsel %vm54_vm0, %v348_v14, 0  ;;  %v284_v16 = vld [vmem:[%s474_s2] ss:$0 sm:$0xff] }
   0x6   :  { %v290_v18 = vld [vmem:[%s475_s4] ss:$0 sm:$0xff] }
   0x7   :  { %v296_v34 = vld [vmem:[%s478_s6] ss:$0 sm:$0xff] }
   0xb   :  { %320 = vmatpush3.bf16.xpose.msra.mxu0 %v62_v7 }
   0xc   :  { %333 = vmatprep.subr.bf16.mxu0 %v349_v0  ;;  %328 = vmatpush3.bf16.xpose.msra.mxu1 %v141_v8 }
  0x12   :  { %322 = vmatmul.mubr.msk.bf16.vlgmr.msra.gmra.mrb[0].mxu0 %vm54_vm0, %v32_v12 }
  0x13   :  { %334 = vmatpush3.bf16.xpose.msra.mxu0 %v216_v13  ;;  %337 = vmatprep.mubr.msk.bf16.mxu0 %vm350_vm1, %v349_v0 }
  0x14   :  { %335 = vmatprep.subr.bf16.mxu0 %v349_v0  ;;  %330 = vmatmul.mubr.msk.bf16.vlgmr.msra.gmra.mrb[0].mxu1 %vm54_vm0, %v32_v12 }
  0x1b   :  { %336 = vmatpush3.bf16.xpose.msra.mxu0 %v219_v15 }
  0x22   :  { %338 = vmatmul.mubr.msk.bf16.vlgmr.msra.gmra.mrb[4].mxu0 %vm54_vm0, %v32_v12 }
  0xe5   :  { %v98_v17 = vpop.f32.mrb[0].mxu0 }
  0xe6   :  { %v99_v19 = vadd.f32 %v284_v16, %v98_v17  ;;  %v323_v20 = vpop.f32.mrb[1].mxu0 }
  0xe7   :  { %v101_v21 = vpop.f32.mrb[2].mxu0  ;;  %v177_v22 = vpop.f32.mrb[0].mxu1 }
  0xe8   :  { %v302_v23 = vpack.c.bf16 %v99_v19, %v99_v19  ;;  %v102_v24 = vadd.f32 %v284_v16, %v101_v21  ;;  %v324_v25 = vpop.f32.mrb[3].mxu0  ;;  %v178_v26 = vadd.f32 %v290_v18, %v177_v22  ;;  %v331_v27 = vpop.f32.mrb[1].mxu1 }
  0xe9   :  { %v180_v28 = vpop.f32.mrb[2].mxu1 }
  0xea   :  { %114 = vst.msk [vmem:[%s476_s7] sm:$0xf] %vm113_vm2, %v302_v23  ;;  %v303_v29 = vpack.c.bf16 %v102_v24, %v102_v24  ;;  %v304_v30 = vpack.c.bf16 %v178_v26, %v178_v26  ;;  %v181_v31 = vadd.f32 %v290_v18, %v180_v28  ;;  %v332_v32 = vpop.f32.mrb[3].mxu1 }
  0xec   :  { %115 = vst.msk [vmem:[%s476_s7 + $0x4] sm:$0xf] %vm113_vm2, %v303_v29  ;;  %192 = vst.msk [vmem:[%s477_s8] sm:$0xf] %vm113_vm2, %v304_v30  ;;  %v305_v33 = vpack.c.bf16 %v181_v31, %v181_v31 }
  0xee   :  { %193 = vst.msk [vmem:[%s477_s8 + $0x4] sm:$0xf] %vm113_vm2, %v305_v33 }
  0xf5   :  { %v255_v35 = vpop.f32.mrb[4].mxu0 }
  0xf6   :  { %v256_v36 = vadd.f32 %v296_v34, %v255_v35  ;;  %v339_v37 = vpop.f32.mrb[5].mxu0 }
  0xf7   :  { %v258_v38 = vpop.f32.mrb[6].mxu0 }
  0xf8   :  { %v306_v39 = vpack.c.bf16 %v256_v36, %v256_v36  ;;  %v259_v40 = vadd.f32 %v296_v34, %v258_v38  ;;  %v340_v41 = vpop.f32.mrb[7].mxu0 }
  0xfa   :  { %270 = vst.msk [vmem:[%s479_s9] sm:$0xf] %vm113_vm2, %v306_v39  ;;  %v307_v42 = vpack.c.bf16 %v259_v40, %v259_v40 }
  0xfc   :  { %271 = vst.msk [vmem:[%s479_s9 + $0x4] sm:$0xf] %vm113_vm2, %v307_v42 }

// kernel: _mha_impl.4
= control target key start
LH: loop header
LB: loop body
LE: loop exit
PB: predicated region body
PF: predicated region fallthrough
CT: control target
= control target key end

     0   :  { %10 = vsyncpa [#allocation7], 0  ;;  %s2153_s0 = inlined_call_operand.vmem [shape: bf16[8,2,4,8], index: 0, kind: input, shape index: {}]   ;;  %s2154_s1 = inlined_call_operand.vmem [shape: bf16[8,2,4,8], index: 1, kind: input, shape index: {}]   ;;  %s2155_s2 = inlined_call_operand.vmem [shape: bf16[8,2,4,8], index: 2, kind: input, shape index: {}]   ;;  %s2156_s3 = inlined_call_operand.vmem [shape: bf16[8,2,4,8], index: 3, kind: output, shape index: {0}]   ;;  %s2157_s4 = inlined_call_operand.hbm [shape: f32[2,8,8], index: 4, kind: output, shape index: {1}]  }
   0x1   :  { %12 = vsyncpa [#allocation7 + $0x1], 0  ;;  %s1885_s15 = smov 0   ;;  %s1887_s16 = smov 0  }
   0x2   :  { %s1889_s17 = smov 0   ;;  %s1891_s18 = smov 0  }
   0x3   :  { %s1893_s19 = smov 0   ;;  %s1895_s20 = smov 0  }
   0x4 LB: > { %s1580_s21 = sadd.s32 4294967295, %s1852_s20   ;;  %s1581_s22 = sadd.s32 4294967294, %s1852_s20   ;;  %s1852_s20 = sphi %s1895_s20, %s18_s20   ;;  %s1848_s19 = sphi %s1893_s19, %s2167_s19   ;;  %s1844_s18 = sphi %s1891_s18, %s2166_s18   ;;  %s1840_s17 = sphi %s1889_s17, %s2165_s17   ;;  %s1836_s16 = sphi %s1887_s16, %s2164_s16   ;;  %s1832_s15 = sphi %s1885_s15, %s2163_s15  }
   0x5   : > { %s37_s23 = sadd.s32 1, %s1848_s19  ;;  %s48_s24 = sadd.s32 1, %s1840_s17 }
   0x6   : > { %p39_p0 = scmp.ge.s32.totalorder %s37_s23, 2  ;;  %p55_p1 = scmp.ne.s32.totalorder %s1840_s17, %s1836_s16 }
   0x7   : > { %p56_p2 = scmp.eq.s32.totalorder %s1852_s20, 0  ;;  %p145_p3 = scmp.eq.s32.totalorder %s1580_s21, 1 }
   0x8   : > { %s2169_s23 = smov (%p39_p0, %s37_s23), 0  ;;  %p178_p6 = scmp.ne.s32.totalorder %s1836_s16, %s1832_s15 }
   0x9   : > { %p1924_p4 = por %p56_p2, %p55_p1  ;;  %p1928_p5 = por %p145_p3, %p55_p1 }
   0xa   : > { %s42_s27 = ssub.s32 %s1848_s19, %s2169_s23  ;;  %p179_p8 = scmp.eq.s32.totalorder %s1581_s22, 1 }
   0xb   : > { %p46_p7 = scmp.eq.s32.totalorder %s42_s27, 0  ;;  %p2158_p10 = scmp.ge.s32.totalorder %s1852_s20, 2 }
   0xc   : > { %p1939_p9 = por %p179_p8, %p178_p6 }
   0xd   : > { %s1937_s28 = scalar_select %p46_p7, %s1840_s17, %s48_s24  }
   0xe   : > { %195 = sbr.rel (%p2158_p10) target bundleno = 48 (0x30), region = 16 }
  0x15   : > { %198 = sbr.rel (!%p1924_p4) target bundleno = 30 (0x1e), region = 20  ;;  %s200_s30 = sand.u32 (%p1924_p4), 1, %s1840_s17  }
  0x16   : > { %s1585_s5 = sshll.u32 (%p1924_p4), %s1848_s19, 1  ;;  %s1584_s6 = sshll.u32 (%p1924_p4), %s200_s30, 4 }
  0x17   : > { %s208_s9 = scalar_lea.vmem (%p1924_p4), %s2153_s0, %s1585_s5  ;;  %s202_s10 = scalar_lea.vmem (%p1924_p4), [#allocation2], %s1584_s6 }
  0x18   : > { %v224_v0 = vld [vmem:[%s208_s9] sm:$0x3] (%p1924_p4)  ;;  %v226_v1 = vld [vmem:[%s208_s9 + $0x4] sm:$0x3] (%p1924_p4)  ;;  %v228_v2 = vld [vmem:[%s208_s9 + $0x8] sm:$0x3] (%p1924_p4) }
  0x19   : > { %225 = vst [vmem:[%s202_s10] sm:$0x3] (%p1924_p4), %v224_v0  ;;  %227 = vst [vmem:[%s202_s10 + $0x2] sm:$0x3] (%p1924_p4), %v226_v1  ;;  %v230_v3 = vld [vmem:[%s208_s9 + $0xc] sm:$0x3] (%p1924_p4) }
  0x1a   : > { %v232_v4 = vld [vmem:[%s208_s9 + $0x10] sm:$0x3] (%p1924_p4)  ;;  %229 = vst [vmem:[%s202_s10 + $0x4] sm:$0x3] (%p1924_p4), %v228_v2  ;;  %231 = vst [vmem:[%s202_s10 + $0x6] sm:$0x3] (%p1924_p4), %v230_v3 }
  0x1b   : > { %233 = vst [vmem:[%s202_s10 + $0x8] sm:$0x3] (%p1924_p4), %v232_v4  ;;  %v234_v5 = vld [vmem:[%s208_s9 + $0x14] sm:$0x3] (%p1924_p4)  ;;  %v236_v6 = vld [vmem:[%s208_s9 + $0x18] sm:$0x3] (%p1924_p4) }
  0x1c   : > { %v238_v7 = vld [vmem:[%s208_s9 + $0x1c] sm:$0x3]  ;;  %235 = vst [vmem:[%s202_s10 + $0xa] sm:$0x3] %v234_v5  ;;  %237 = vst [vmem:[%s202_s10 + $0xc] sm:$0x3] %v236_v6 }
  0x1d   : > { %239 = vst [vmem:[%s202_s10 + $0xe] sm:$0x3] %v238_v7 }
  0x1e PF: > { %278 = sbr.rel (!%p1924_p4) target bundleno = 39 (0x27), region = 61  ;;  %s280_s11 = sand.u32 (%p1924_p4), 1, %s1840_s17  }
  0x1f   : > { %s1587_s12 = sshll.u32 (%p1924_p4), %s1848_s19, 1  ;;  %s1586_s13 = sshll.u32 (%p1924_p4), %s280_s11, 4 }
  0x20   : > { %s285_s22 = scalar_lea.vmem (%p1924_p4), %s2154_s1, %s1587_s12  ;;  %s282_s24 = scalar_lea.vmem (%p1924_p4), [#allocation3], %s1586_s13 }
  0x21   : > { %v301_v8 = vld [vmem:[%s285_s22] sm:$0x3] (%p1924_p4)  ;;  %v303_v9 = vld [vmem:[%s285_s22 + $0x4] sm:$0x3] (%p1924_p4)  ;;  %v305_v10 = vld [vmem:[%s285_s22 + $0x8] sm:$0x3] (%p1924_p4) }
  0x22   : > { %302 = vst [vmem:[%s282_s24] sm:$0x3] (%p1924_p4), %v301_v8  ;;  %304 = vst [vmem:[%s282_s24 + $0x2] sm:$0x3] (%p1924_p4), %v303_v9  ;;  %v307_v11 = vld [vmem:[%s285_s22 + $0xc] sm:$0x3] (%p1924_p4) }
  0x23   : > { %v309_v12 = vld [vmem:[%s285_s22 + $0x10] sm:$0x3] (%p1924_p4)  ;;  %306 = vst [vmem:[%s282_s24 + $0x4] sm:$0x3] (%p1924_p4), %v305_v10  ;;  %308 = vst [vmem:[%s282_s24 + $0x6] sm:$0x3] (%p1924_p4), %v307_v11 }
  0x24   : > { %310 = vst [vmem:[%s282_s24 + $0x8] sm:$0x3] (%p1924_p4), %v309_v12  ;;  %v311_v13 = vld [vmem:[%s285_s22 + $0x14] sm:$0x3] (%p1924_p4)  ;;  %v313_v14 = vld [vmem:[%s285_s22 + $0x18] sm:$0x3] (%p1924_p4) }
  0x25   : > { %v315_v15 = vld [vmem:[%s285_s22 + $0x1c] sm:$0x3]  ;;  %312 = vst [vmem:[%s282_s24 + $0xa] sm:$0x3] %v311_v13  ;;  %314 = vst [vmem:[%s282_s24 + $0xc] sm:$0x3] %v313_v14 }
  0x26   : > { %316 = vst [vmem:[%s282_s24 + $0xe] sm:$0x3] %v315_v15 }
  0x27 PF: > { %355 = sbr.rel (!%p1924_p4) target bundleno = 48 (0x30), region = 102  ;;  %s357_s27 = sand.u32 (%p1924_p4), 1, %s1840_s17  }
  0x28   : > { %s1589_s30 = sshll.u32 (%p1924_p4), %s1848_s19, 1  ;;  %s1588_s5 = sshll.u32 (%p1924_p4), %s357_s27, 4 }
  0x29   : > { %s362_s8 = scalar_lea.vmem (%p1924_p4), %s2155_s2, %s1589_s30  ;;  %s359_s9 = scalar_lea.vmem (%p1924_p4), [#allocation4], %s1588_s5 }
  0x2a   : > { %v378_v16 = vld [vmem:[%s362_s8] sm:$0x3] (%p1924_p4)  ;;  %v380_v17 = vld [vmem:[%s362_s8 + $0x4] sm:$0x3] (%p1924_p4)  ;;  %v382_v18 = vld [vmem:[%s362_s8 + $0x8] sm:$0x3] (%p1924_p4) }
  0x2b   : > { %379 = vst [vmem:[%s359_s9] sm:$0x3] (%p1924_p4), %v378_v16  ;;  %381 = vst [vmem:[%s359_s9 + $0x2] sm:$0x3] (%p1924_p4), %v380_v17  ;;  %v384_v19 = vld [vmem:[%s362_s8 + $0xc] sm:$0x3] (%p1924_p4) }
  0x2c   : > { %v386_v20 = vld [vmem:[%s362_s8 + $0x10] sm:$0x3] (%p1924_p4)  ;;  %383 = vst [vmem:[%s359_s9 + $0x4] sm:$0x3] (%p1924_p4), %v382_v18  ;;  %385 = vst [vmem:[%s359_s9 + $0x6] sm:$0x3] (%p1924_p4), %v384_v19 }
  0x2d   : > { %387 = vst [vmem:[%s359_s9 + $0x8] sm:$0x3] (%p1924_p4), %v386_v20  ;;  %v388_v21 = vld [vmem:[%s362_s8 + $0x14] sm:$0x3] (%p1924_p4)  ;;  %v390_v22 = vld [vmem:[%s362_s8 + $0x18] sm:$0x3] (%p1924_p4) }
  0x2e   : > { %v392_v23 = vld [vmem:[%s362_s8 + $0x1c] sm:$0x3]  ;;  %389 = vst [vmem:[%s359_s9 + $0xa] sm:$0x3] %v388_v21  ;;  %391 = vst [vmem:[%s359_s9 + $0xc] sm:$0x3] %v390_v22 }
  0x2f   : > { %393 = vst [vmem:[%s359_s9 + $0xe] sm:$0x3] %v392_v23 }
  0x30 PF: > { %p1590_p11 = scmp.ge.s32.totalorder %s1852_s20, 1  ;;  %p431_p12 = scmp.lt.s32.totalorder %s1852_s20, 3 }
  0x32   : > { %p432_p13 = pnand %p1590_p11, %p431_p12 }
  0x33   : > { %s1970_s25 = sand.u32 (!%p432_p13), 1, %s1836_s16   ;;  %v510_v24 = vlaneseq (!%p432_p13)  ;;  %v1854_v25 = vmov (!%p432_p13), 0.0   ;;  %v1855_v26 = vmov (!%p432_p13), 1934713408   ;;  %v1856_v29 = vmov (!%p432_p13), 1983009808  }
  0x34   : > { %435 = sbr.rel (%p432_p13) target bundleno = 872 (0x368), region = 143  ;;  %1626 = vmatprep.subr.bf16.mxu0 (!%p432_p13), %v1854_v25  ;;  %s1974_s10 = sshll.u32 (!%p432_p13), %s1970_s25, 4  ;;  %v508_v27 = vunpack.c.l.s4 (!%p432_p13), %v1855_v26  ;;  %1632 = vmatprep.subr.bf16.mxu1 (!%p432_p13), %v1854_v25  ;;  %v704_v30 = vunpack.c.l.s4 (!%p432_p13), %v1856_v29  ;;  %vm1857_vm0 = vmmov (!%p432_p13), 0   ;;  %vm496_vm1 = vcmask (!%p432_p13), 64512  }
  0x35   : > { %v511_v28 = vshrl.u32 (!%p432_p13), %v510_v24, 7  ;;  %1628 = vmatprep.mubr.msk.bf16.mxu0 (!%p432_p13), %vm1857_vm0, %v1854_v25  ;;  %1634 = vmatprep.mubr.msk.bf16.mxu1 (!%p432_p13), %vm1857_vm0, %v1854_v25  ;;  %s447_s11 = scalar_lea.vmem (!%p432_p13), [#allocation3], %s1974_s10  ;;  %s440_s12 = scalar_lea.vmem (!%p432_p13), [#allocation2], %s1974_s10  ;;  %v1858_v40 = vmov (!%p432_p13), 0   ;;  %vm1010_vm2 = vcmask (!%p432_p13), 1043456   ;;  %vm1316_vm3 = vcmask (!%p432_p13), 58368  }
  0x36   : > { %v509_v31 = vunpack.c.0.s8 (!%p432_p13), %v508_v27  ;;  %v1762_v33 = vld.sshfl [vmem:[%s447_s11] sm:$0x33 pattern:$0x73516240] (!%p432_p13)  ;;  %v705_v34 = vunpack.c.0.s8 (!%p432_p13), %v704_v30  ;;  %s454_s13 = scalar_lea.vmem (!%p432_p13), [#allocation4], %s1974_s10  ;;  %s1595_s14 = sshll.u32 (!%p432_p13), %s1970_s25, 3 }
  0x37   : > { %v1763_v35 = vld.sshfl [vmem:[%s447_s11 + $0x2] sm:$0x33 pattern:$0x73516240] (!%p432_p13)  ;;  %v613_v39 = vshrl.u32 (!%p432_p13), %v1762_v33, 16  ;;  %v582_v41 = vcombine.high (!%p432_p13), %v1762_v33, %v1858_v40  ;;  %s2057_s21 = scalar_lea.vmem (!%p432_p13), [#allocation6], %s1595_s14 }
  0x38   : > { %v1982_v32 = vsub.s32 (!%p432_p13), %v509_v31, %v511_v28  ;;  %v1764_v36 = vld.sshfl [vmem:[%s447_s11 + $0x8] sm:$0x33 pattern:$0x73516240] (!%p432_p13)  ;;  %v1985_v38 = vsub.s32 (!%p432_p13), %v705_v34, %v511_v28  ;;  %v612_v42 = vpack.i.b16 (!%p432_p13), %v1763_v35, %v1762_v33  ;;  %v614_v44 = vshrl.u32 (!%p432_p13), %v1763_v35, 16  ;;  %497 = vst.msk [vmem:[%s2057_s21] sm:$0xff] (!%p432_p13), %vm496_vm1, %v1854_v25 }
  0x39   : > { %v1765_v37 = vld.sshfl [vmem:[%s447_s11 + $0xa] sm:$0x33 pattern:$0x73516240] (!%p432_p13)  ;;  %v625_v45 = vshrl.u32 (!%p432_p13), %v1764_v36, 16  ;;  %v591_v51 = vcombine.high (!%p432_p13), %v1763_v35, %v1858_v40  ;;  %v600_v52 = vcombine.high (!%p432_p13), %v1764_v36, %v1858_v40  ;;  %v619_v5 = vshrl.u32 (!%p432_p13), %v582_v41, 16 }
  0x3a   : > { %v624_v43 = vpack.i.b16 (!%p432_p13), %v1765_v37, %v1764_v36  ;;  %v1766_v46 = vld.sshfl [vmem:[%s440_s12] sm:$0x33 pattern:$0x73516240] (!%p432_p13)  ;;  %v626_v48 = vshrl.u32 (!%p432_p13), %v1765_v37, 16  ;;  %v609_v53 = vcombine.high (!%p432_p13), %v1765_v37, %v1858_v40  ;;  %v615_v55 = vpack.i.b16 (!%p432_p13), %v614_v44, %v613_v39  ;;  %s481_s22 = scalar_lea.vmem (!%p432_p13), [#allocation5], %s1974_s10 }
  0x3b   : > { %v1767_v47 = vld.sshfl [vmem:[%s440_s12 + $0x2] sm:$0x33 pattern:$0x73516240]  ;;  %v618_v57 = vpack.i.b16 %v591_v51, %v582_v41  ;;  %v545_v61 = vshrl.u32 %v1766_v46, 16  ;;  %v620_v9 = vshrl.u32 %v591_v51, 16  ;;  %v514_v16 = vcombine.high %v1766_v46, %v1858_v40 }
  0x3c   : > { %v1768_v49 = vld.sshfl [vmem:[%s440_s12 + $0x8] sm:$0x33 pattern:$0x73516240]  ;;  %v710_v54 = vcombine.low %v612_v42, %v624_v43  ;;  %v627_v56 = vpack.i.b16 %v626_v48, %v625_v45  ;;  %v544_v59 = vpack.i.b16 %v1767_v47, %v1766_v46  ;;  %v630_v60 = vpack.i.b16 %v609_v53, %v600_v52  ;;  %s1341_s24 = scalar_lea.sflag [#allocation7], %s1970_s25  ;;  %s1606_s27 = sshll.u32 (%p1928_p5), %s1844_s18, 1 }
  0x3d   : > { %v1769_v50 = vld.sshfl [vmem:[%s440_s12 + $0xa] sm:$0x33 pattern:$0x73516240]  ;;  %v546_v0 = vshrl.u32 %v1767_v47, 16  ;;  %v557_v1 = vshrl.u32 %v1768_v49, 16  ;;  %v621_v15 = vpack.i.b16 %v620_v9, %v619_v5  ;;  %v523_v20 = vcombine.high %v1767_v47, %v1858_v40  ;;  %s1353_s6 = scalar_lea.vmem (%p1928_p5), %s2156_s3, %s1606_s27 }
  0x3e   : > { %v717_v58 = vrot.slane %v710_v54, %v1985_v38  ;;  %v773_v62 = vcombine.low %v615_v55, %v627_v56  ;;  %v556_v63 = vpack.i.b16 %v1769_v50, %v1768_v49  ;;  %v835_v3 = vcombine.low %v618_v57, %v630_v60 }
  0x3f   : > { %v558_v4 = vshrl.u32 %v1769_v50, 16  ;;  %v547_v8 = vpack.i.b16 %v546_v0, %v545_v61  ;;  %v631_v12 = vshrl.u32 %v600_v52, 16  ;;  %v632_v13 = vshrl.u32 %v609_v53, 16 }
  0x40   : > { %v723_v2 = vsel %vm496_vm1, %v717_v58, 0  ;;  %v780_v6 = vrot.slane %v773_v62, %v1985_v38  ;;  %v702_v7 = vcombine.low %v544_v59, %v556_v63  ;;  %v842_v10 = vrot.slane %v835_v3, %v1985_v38 }
  0x41   : > { %1627 = vmatpush3.bf16.xpose.msra.mxu0 %v723_v2  ;;  %v559_v11 = vpack.i.b16 %v558_v4, %v557_v1  ;;  %v633_v19 = vpack.i.b16 %v632_v13, %v631_v12  ;;  %v532_v21 = vcombine.high %v1768_v49, %v1858_v40  ;;  %v541_v22 = vcombine.high %v1769_v50, %v1858_v40 }
  0x42   : > { %1638 = vmatprep.subr.bf16.mxu0 %v1854_v25  ;;  %v785_v14 = vsel %vm496_vm1, %v780_v6, 0  ;;  %v709_v17 = vrot.slane %v702_v7, %v1985_v38  ;;  %v551_v23 = vshrl.u32 %v514_v16, 16  ;;  %v847_v24 = vsel %vm496_vm1, %v842_v10, 0 }
  0x43   : > { %1633 = vmatpush3.bf16.xpose.msra.mxu1 %v785_v14  ;;  %v765_v18 = vcombine.low %v547_v8, %v559_v11  ;;  %v897_v26 = vcombine.low %v621_v15, %v633_v19  ;;  %v550_v27 = vpack.i.b16 %v523_v20, %v514_v16  ;;  %v552_v28 = vshrl.u32 %v523_v20, 16  ;;  %v1770_v20 = vld.sshfl [vmem:[%s454_s13] sm:$0x33 pattern:$0x73516240] }
  0x44   : > { %1644 = vmatprep.subr.bf16.mxu1 %v1854_v25  ;;  %v562_v30 = vpack.i.b16 %v541_v22, %v532_v21  ;;  %v563_v31 = vshrl.u32 %v532_v21, 16  ;;  %v564_v33 = vshrl.u32 %v541_v22, 16  ;;  %v1771_v21 = vld.sshfl [vmem:[%s454_s13 + $0x2] sm:$0x33 pattern:$0x73516240] }
  0x45   : > { %v772_v29 = vrot.slane %v765_v18, %v1985_v38  ;;  %v904_v34 = vrot.slane %v897_v26, %v1985_v38  ;;  %v553_v35 = vpack.i.b16 %v552_v28, %v551_v23  ;;  %v1772_v22 = vld.sshfl [vmem:[%s454_s13 + $0x8] sm:$0x33 pattern:$0x73516240]  ;;  %v680_v26 = vpack.i.b16 %v1771_v21, %v1770_v20 }
  0x46   : > { %v827_v36 = vcombine.low %v550_v27, %v562_v30  ;;  %v565_v37 = vpack.i.b16 %v564_v33, %v563_v31  ;;  %v1773_v23 = vld.sshfl [vmem:[%s454_s13 + $0xa] sm:$0x33 pattern:$0x73516240]  ;;  %v682_v28 = vshrl.u32 %v1771_v21, 16 }
  0x47   : > { %v909_v39 = vsel %vm496_vm1, %v904_v34, 0  ;;  %v692_v27 = vpack.i.b16 %v1773_v23, %v1772_v22  ;;  %v694_v30 = vshrl.u32 %v1773_v23, 16 }
  0x48   : > { %1629 = vmatmul.mubr.msk.bf16.vlgmr.msra.gmra.mrb[0].mxu0 %vm496_vm1, %v709_v17  ;;  %v889_v41 = vcombine.low %v553_v35, %v565_v37  ;;  %v834_v42 = vrot.slane %v827_v36, %v1985_v38  ;;  %v650_v35 = vcombine.high %v1770_v20, %v1858_v40  ;;  %v659_v36 = vcombine.high %v1771_v21, %v1858_v40 }
  0x49   : > { %1639 = vmatpush3.bf16.xpose.msra.mxu0 %v847_v24  ;;  %1640 = vmatprep.mubr.msk.bf16.mxu0 %vm1857_vm0, %v1854_v25  ;;  %v681_v24 = vshrl.u32 %v1770_v20, 16  ;;  %v999_v31 = vcombine.low %v680_v26, %v692_v27  ;;  %v668_v37 = vcombine.high %v1772_v22, %v1858_v40  ;;  %v1325_v20 = vld [vmem:[%s2057_s21] sm:$0xff] }
  0x4a   : > { %1650 = vmatprep.subr.bf16.mxu0 %v1854_v25  ;;  %1635 = vmatmul.mubr.msk.bf16.vlgmr.msra.gmra.mrb[0].mxu1 %vm496_vm1, %v772_v29  ;;  %v896_v43 = vrot.slane %v889_v41, %v1985_v38  ;;  %v693_v29 = vshrl.u32 %v1772_v22, 16  ;;  %v677_v41 = vcombine.high %v1773_v23, %v1858_v40 }
  0x4b   : > { %1645 = vmatpush3.bf16.xpose.msra.mxu1 %v909_v39  ;;  %1646 = vmatprep.mubr.msk.bf16.mxu1 %vm1857_vm0, %v1854_v25  ;;  %v683_v33 = vpack.i.b16 %v682_v28, %v681_v24  ;;  %v1006_v39 = vrot.slane %v999_v31, %v1985_v38 }
  0x4c   : > { %1656 = vmatprep.subr.bf16.mxu1 %v1854_v25  ;;  %v695_v34 = vpack.i.b16 %v694_v30, %v693_v29 }
  0x50   : > { %1641 = vmatmul.mubr.msk.bf16.vlgmr.msra.gmra.mrb[4].mxu0 %vm496_vm1, %v834_v42  ;;  %v1054_v42 = vcombine.low %v683_v33, %v695_v34 }
  0x51   : > { %1652 = vmatprep.mubr.msk.bf16.mxu0 %vm1857_vm0, %v1854_v25 }
  0x52   : > { %1647 = vmatmul.mubr.msk.bf16.vlgmr.msra.gmra.mrb[4].mxu1 %vm496_vm1, %v896_v43  ;;  %v686_v43 = vpack.i.b16 %v659_v36, %v650_v35 }
  0x53   : > { %1658 = vmatprep.mubr.msk.bf16.mxu1 %vm1857_vm0, %v1854_v25 }
 0x11b   : > { %v759_v44 = vpop.f32.mrb[0].mxu0 }
 0x11c   : > { %v1630_v45 = vpop.f32.mrb[1].mxu0  ;;  %v951_v46 = vsel %vm496_vm1, %v759_v44, -inf }
 0x11d   : > { %952 = vmax.xlane.f32.xlu0 %v951_v46  ;;  %v762_v47 = vpop.f32.mrb[2].mxu0  ;;  %v821_v48 = vpop.f32.mrb[0].mxu1  ;;  %v698_v45 = vpack.i.b16 %v677_v41, %v668_v37  ;;  %v1061_v46 = vrot.slane %v1054_v42, %v1985_v38 }
 0x11e   : > { %v1631_v49 = vpop.f32.mrb[3].mxu0  ;;  %v1636_v50 = vpop.f32.mrb[1].mxu1  ;;  %v954_v51 = vsel %vm496_vm1, %v821_v48, -inf  ;;  %v687_v47 = vshrl.u32 %v650_v35, 16 }
 0x11f   : > { %v824_v52 = vpop.f32.mrb[2].mxu1  ;;  %v699_v49 = vshrl.u32 %v668_v37, 16  ;;  %v1108_v50 = vcombine.low %v686_v43, %v698_v45 }
 0x120   : > { %v1637_v53 = vpop.f32.mrb[3].mxu1  ;;  %v1066_v52 = vsel %vm1010_vm2, %v1061_v46, 0 }
 0x121   : > { %955 = vmax.xlane.f32.xlu0 %v954_v51  ;;  %v700_v51 = vshrl.u32 %v677_v41, 16  ;;  %1657 = vmatpush3.bf16.msra.mxu1 %v1066_v52 }
 0x122   : > { %1668 = vmatprep.subr.bf16.mxu1 %v1854_v25 }
 0x123   : > { %v883_v54 = vpop.f32.mrb[4].mxu0 }
 0x124   : > { %v1642_v55 = vpop.f32.mrb[5].mxu0  ;;  %v957_v56 = vsel %vm496_vm1, %v883_v54, -inf }
 0x125   : > { %958 = vmax.xlane.f32.xlu1 %v957_v56  ;;  %v886_v57 = vpop.f32.mrb[6].mxu0  ;;  %v945_v58 = vpop.f32.mrb[4].mxu1  ;;  %v701_v55 = vpack.i.b16 %v700_v51, %v699_v49 }
 0x126   : > { %v1643_v59 = vpop.f32.mrb[7].mxu0  ;;  %v1648_v60 = vpop.f32.mrb[5].mxu1  ;;  %v960_v61 = vsel %vm496_vm1, %v945_v58, -inf }
 0x127   : > { %v948_v62 = vpop.f32.mrb[6].mxu1 }
 0x128   : > { %v1649_v63 = vpop.f32.mrb[7].mxu1 }
 0x129   : > { %961 = vmax.xlane.f32.xlu1 %v960_v61 }
 0x1aa   : > { %v953_v0 = vpop.xlane.xlu0 %952 }
 0x1ab   : > { %v963_v1 = vsub.f32 %v759_v44, %v953_v0  ;;  %v1012_v44 = vsel %vm1010_vm2, %v1006_v39, 0 }
 0x1ac   : > { %1651 = vmatpush3.bf16.msra.mxu0 %v1012_v44 }
 0x1ad   : > { %v967_v2 = vmul.f32 1.442695, %v963_v1  ;;  %1662 = vmatprep.subr.bf16.mxu0 %v1854_v25 }
 0x1ae   : > { %v956_v3 = vpop.xlane.xlu0 %955 }
 0x1af   : > { %1746 = vpow2.f32 %v967_v2  ;;  %v964_v4 = vsub.f32 %v821_v48, %v956_v3  ;;  %v688_v48 = vshrl.u32 %v659_v36, 16 }
 0x1b1   : > { %v969_v5 = vmul.f32 1.442695, %v964_v4  ;;  %v689_v53 = vpack.i.b16 %v688_v48, %v687_v47 }
 0x1b2   : > { %v959_v6 = vpop.xlane.xlu1 %958 }
 0x1b3   : > { %1748 = vpow2.f32 %v969_v5  ;;  %v965_v7 = vsub.f32 %v883_v54, %v959_v6  ;;  %v1115_v54 = vrot.slane %v1108_v50, %v1985_v38  ;;  %v1162_v57 = vcombine.low %v689_v53, %v701_v55 }
 0x1b5   : > { %v971_v8 = vmul.f32 1.442695, %v965_v7  ;;  %v1120_v56 = vsel %vm1010_vm2, %v1115_v54, 0 }
 0x1b6   : > { %v962_v9 = vpop.xlane.xlu1 %961 }
 0x1b7   : > { %1750 = vpow2.f32 %v971_v8  ;;  %v966_v10 = vsub.f32 %v945_v58, %v962_v9  ;;  %v1169_v58 = vrot.slane %v1162_v57, %v1985_v38 }
 0x1b9   : > { %v2027_v11 = vpop.eup %1746  ;;  %v973_v12 = vmul.f32 1.442695, %v966_v10  ;;  %v1174_v59 = vsel %vm1010_vm2, %v1169_v58, 0 }
 0x1ba   : > { %v975_v13 = vsel %vm496_vm1, %v2027_v11, 0.0 }
 0x1bb   : > { %1752 = vpow2.f32 %v973_v12  ;;  %976 = vadd.xlane.f32.xlu0 %v975_v13 }
 0x1bd   : > { %v2031_v14 = vpop.eup %1748 }
 0x1be   : > { %v978_v15 = vsel %vm496_vm1, %v2031_v14, 0.0 }
 0x1bf   : > { %979 = vadd.xlane.f32.xlu1 %v978_v15 }
 0x1c1   : > { %v2035_v16 = vpop.eup %1750 }
 0x1c2   : > { %v981_v17 = vsel %vm496_vm1, %v2035_v16, 0.0 }
 0x1c3   : > { %982 = vadd.xlane.f32.xlu0 %v981_v17 }
 0x1c5   : > { %v2039_v18 = vpop.eup %1752 }
 0x1c6   : > { %v984_v19 = vsel %vm496_vm1, %v2039_v18, 0.0 }
 0x1c7   : > { %985 = vadd.xlane.f32.xlu1 %v984_v19 }
 0x248   : > { %v977_v60 = vpop.xlane.xlu0 %976 }
 0x249   : > { %1754 = vrcp.f32 %v977_v60 }
 0x24c   : > { %v980_v61 = vpop.xlane.xlu1 %979 }
 0x24d   : > { %1756 = vrcp.f32 %v980_v61 }
 0x250   : > { %v983_v62 = vpop.xlane.xlu0 %982 }
 0x251   : > { %1758 = vrcp.f32 %v983_v62 }
 0x253   : > { %v1755_v63 = vpop.eup %1754 }
 0x254   : > { %v991_v0 = vmul.f32 %v1755_v63, %v2027_v11  ;;  %v986_v1 = vpop.xlane.xlu1 %985 }
 0x255   : > { %1760 = vrcp.f32 %v986_v1 }
 0x256   : > { %v995_v2 = vpack.c.bf16 %v991_v0, %v991_v0  ;;  %v1326_v9 = vsel %vm496_vm1, %v991_v0, 0.0 }
 0x257   : > { %v1757_v3 = vpop.eup %1756 }
 0x258   : > { %v992_v4 = vmul.f32 %v1757_v3, %v2031_v14  ;;  %1653 = vmatmul.mubr.msk.bf16.vlgmr.msra.gmra.mrb[8].mxu0 %vm496_vm1, %v995_v2 }
 0x259   : > { %1663 = vmatpush3.bf16.msra.mxu0 %v1120_v56  ;;  %1664 = vmatprep.mubr.msk.bf16.mxu0 %vm1857_vm0, %v1854_v25 }
 0x25a   : > { %v996_v5 = vpack.c.bf16 %v992_v4, %v992_v4  ;;  %v1327_v7 = vsel %vm496_vm1, %v992_v4, 0.0 }
 0x25b   : > { %v1759_v6 = vpop.eup %1758  ;;  %v1328_v13 = vadd.f32 %v1327_v7, %v1326_v9 }
 0x25c   : > { %v993_v8 = vmul.f32 %v1759_v6, %v2035_v16  ;;  %1659 = vmatmul.mubr.msk.bf16.vlgmr.msra.gmra.mrb[8].mxu1 %vm496_vm1, %v996_v5 }
 0x25d   : > { %1669 = vmatpush3.bf16.msra.mxu1 %v1174_v59  ;;  %1670 = vmatprep.mubr.msk.bf16.mxu1 %vm1857_vm0, %v1854_v25 }
 0x25e   : > { %v1329_v10 = vsel %vm496_vm1, %v993_v8, 0.0  ;;  %v997_v11 = vpack.c.bf16 %v993_v8, %v993_v8 }
 0x25f   : > { %v1761_v12 = vpop.eup %1760  ;;  %v1330_v15 = vadd.f32 %v1329_v10, %v1328_v13 }
 0x260   : > { %v994_v14 = vmul.f32 %v1761_v12, %v2039_v18  ;;  %1665 = vmatmul.mubr.msk.bf16.vlgmr.msra.gmra.mrb[12].mxu0 %vm496_vm1, %v997_v11 }
 0x262   : > { %v1331_v16 = vsel %vm496_vm1, %v994_v14, 0.0  ;;  %v998_v17 = vpack.c.bf16 %v994_v14, %v994_v14 }
 0x263   : > { %v1332_v19 = vadd.f32 %v1331_v16, %v1330_v15 }
 0x264   : > { %1671 = vmatmul.mubr.msk.bf16.vlgmr.msra.gmra.mrb[12].mxu1 %vm496_vm1, %v998_v17 }
 0x265   : > { %v1333_v25 = vmul.f32 0.25, %v1332_v19 }
 0x267   : > { %v1334_v21 = vadd.f32 %v1333_v25, %v1325_v20 }
 0x269   : > { %1335 = vst.msk [vmem:[%s2057_s21] sm:$0xff] %vm496_vm1, %v1334_v21 }
 0x32b   : > { %v1048_v22 = vpop.f32.mrb[8].mxu0 }
 0x32c   : > { %v1654_v23 = vpop.f32.mrb[9].mxu0  ;;  %v1216_v29 = vpack.c.bf16 %v1048_v22, %v1048_v22 }
 0x32d   : > { %v1051_v24 = vpop.f32.mrb[10].mxu0 }
 0x32e   : > { %v1655_v26 = vpop.f32.mrb[11].mxu0  ;;  %v1223_v36 = vrot.slane %v1216_v29, %v1985_v38 }
 0x32f   : > { %v1102_v27 = vpop.f32.mrb[8].mxu1 }
 0x330   : > { %v1660_v18 = vpop.f32.mrb[9].mxu1  ;;  %v1250_v41 = vpack.c.bf16 %v1102_v27, %v1102_v27 }
 0x331   : > { %v1105_v28 = vpop.f32.mrb[10].mxu1 }
 0x332   : > { %v1661_v30 = vpop.f32.mrb[11].mxu1  ;;  %v1257_v51 = vrot.slane %v1250_v41, %v1985_v38 }
 0x333   : > { %v1156_v31 = vpop.f32.mrb[12].mxu0 }
 0x334   : > { %v1224_v33 = vpack.c.bf16 %v1156_v31, %v1156_v31  ;;  %v1666_v34 = vpop.f32.mrb[13].mxu0 }
 0x335   : > { %v1159_v35 = vpop.f32.mrb[14].mxu0 }
 0x336   : > { %v1231_v37 = vrot.slane %v1224_v33, %v1985_v38  ;;  %v1667_v39 = vpop.f32.mrb[15].mxu0 }
 0x337   : > { %v1210_v42 = vpop.f32.mrb[12].mxu1 }
 0x338   : > { %v1232_v43 = vcombine.low %v1223_v36, %v1231_v37  ;;  %v1233_v44 = vcombine.high %v1223_v36, %v1231_v37  ;;  %v1258_v45 = vpack.c.bf16 %v1210_v42, %v1210_v42  ;;  %v1672_v46 = vpop.f32.mrb[13].mxu1 }
 0x339   : > { %v1213_v47 = vpop.f32.mrb[14].mxu1 }
 0x33a   : > { %v1240_v48 = vrot.slane %v1232_v43, %v1982_v32  ;;  %v1265_v49 = vrot.slane %v1258_v45, %v1985_v38  ;;  %v1673_v50 = vpop.f32.mrb[15].mxu1  ;;  %v1247_v52 = vrot.slane %v1233_v44, %v1982_v32 }
 0x33c   : > { %v1266_v53 = vcombine.low %v1257_v51, %v1265_v49  ;;  %v1267_v54 = vcombine.high %v1257_v51, %v1265_v49  ;;  %v1248_v55 = vcombine.high %v1240_v48, %v1858_v40  ;;  %v1249_v58 = vcombine.high %v1247_v52, %v1858_v40 }
 0x33d   : > { %v1288_v59 = vshrl.u32 %v1240_v48, 16  ;;  %v1304_v0 = vshrl.u32 %v1247_v52, 16 }
 0x33e   : > { %v1274_v56 = vrot.slane %v1266_v53, %v1982_v32  ;;  %v1281_v57 = vrot.slane %v1267_v54, %v1982_v32  ;;  %v1296_v63 = vshrl.u32 %v1248_v55, 16  ;;  %v1312_v6 = vshrl.u32 %v1249_v58, 16 }
 0x340   : > { %v1282_v60 = vcombine.high %v1274_v56, %v1858_v40  ;;  %v1283_v61 = vcombine.high %v1281_v57, %v1858_v40  ;;  %v1286_v38 = vpack.i.b16 %v1274_v56, %v1240_v48  ;;  %v1289_v62 = vshrl.u32 %v1274_v56, 16 }
 0x341   : > { %v1302_v1 = vpack.i.b16 %v1281_v57, %v1247_v52  ;;  %v1305_v2 = vshrl.u32 %v1281_v57, 16  ;;  %1347 = sbr.rel (!%p1928_p5) target bundleno = 848 (0x350), region = 163 }
 0x342   : > { %v1290_v3 = vpack.i.b16 %v1289_v62, %v1288_v59  ;;  %v1294_v4 = vpack.i.b16 %v1282_v60, %v1248_v55  ;;  %v1297_v5 = vshrl.u32 %v1282_v60, 16  ;;  %v1310_v32 = vpack.i.b16 %v1283_v61, %v1249_v58  ;;  %1317 = vst.msk [vmem:[%s481_s22] sm:$0x3] %vm1316_vm3, %v1286_v38 }
 0x343   : > { %v1306_v7 = vpack.i.b16 %v1305_v2, %v1304_v0  ;;  %v1313_v8 = vshrl.u32 %v1283_v61, 16  ;;  %1321 = vst.msk [vmem:[%s481_s22 + $0x8] sm:$0x3] %vm1316_vm3, %v1302_v1 }
 0x344   : > { %v1298_v40 = vpack.i.b16 %v1297_v5, %v1296_v63  ;;  %1318 = vst.msk [vmem:[%s481_s22 + $0x2] sm:$0x3] %vm1316_vm3, %v1290_v3  ;;  %1319 = vst.msk [vmem:[%s481_s22 + $0x4] sm:$0x3] %vm1316_vm3, %v1294_v4 }
 0x345   : > { %1323 = vst.msk [vmem:[%s481_s22 + $0xc] sm:$0x3] %vm1316_vm3, %v1310_v32  ;;  %v1314_v9 = vpack.i.b16 %v1313_v8, %v1312_v6  ;;  %1322 = vst.msk [vmem:[%s481_s22 + $0xa] sm:$0x3] %vm1316_vm3, %v1306_v7 }
 0x346   : > { %1320 = vst.msk [vmem:[%s481_s22 + $0x6] sm:$0x3] %vm1316_vm3, %v1298_v40 }
 0x347   : > { %1324 = vst.msk [vmem:[%s481_s22 + $0xe] sm:$0x3] %vm1316_vm3, %v1314_v9 }
 0x349   : > { %v1369_v10 = vld [vmem:[%s481_s22] sm:$0x3] }
 0x34a   : > { %v1377_v14 = vld [vmem:[%s481_s22 + $0x8] sm:$0x3]  ;;  %1370 = vst [vmem:[%s1353_s6] sm:$0x3] %v1369_v10 }
 0x34b   : > { %v1371_v11 = vld [vmem:[%s481_s22 + $0x2] sm:$0x3]  ;;  %v1373_v12 = vld [vmem:[%s481_s22 + $0x4] sm:$0x3]  ;;  %1378 = vst [vmem:[%s1353_s6 + $0x10] sm:$0x3] %v1377_v14 }
 0x34c   : > { %1372 = vst [vmem:[%s1353_s6 + $0x4] sm:$0x3] %v1371_v11  ;;  %1374 = vst [vmem:[%s1353_s6 + $0x8] sm:$0x3] %v1373_v12  ;;  %v1379_v15 = vld [vmem:[%s481_s22 + $0xa] sm:$0x3] }
 0x34d   : > { %v1375_v13 = vld [vmem:[%s481_s22 + $0x6] sm:$0x3]  ;;  %v1381_v16 = vld [vmem:[%s481_s22 + $0xc] sm:$0x3]  ;;  %1380 = vst [vmem:[%s1353_s6 + $0x14] sm:$0x3] %v1379_v15 }
 0x34e   : > { %1376 = vst [vmem:[%s1353_s6 + $0xc] sm:$0x3] %v1375_v13  ;;  %v1383_v17 = vld [vmem:[%s481_s22 + $0xe] sm:$0x3]  ;;  %1382 = vst [vmem:[%s1353_s6 + $0x18] sm:$0x3] %v1381_v16 }
 0x34f   : > { %1384 = vst [vmem:[%s1353_s6 + $0x1c] sm:$0x3] %v1383_v17 }
 0x350 PF: > { %s1607_s7 = sshll.u32 %s1844_s18, 7  ;;  %s1431_s8 = sshll.u32 %s2057_s21, 4  ;;  %s1432_s8 = int_to_ptr.vmem [resolvable:$true] %s1431_s8 }
 0x351   : > { %s1429_s11 = scalar_lea.hbm %s2157_s4, %s1607_s7  ;;  %s1774_s12 = scalar_lea.vmem %s1432_s8, 128 }
 0x352   : > { %p1775_p0 = scmp.ne.s32.totalorder %s1432_s8, %s1774_s12  ;;  %s1859_s13 = smov [#allocation6]  }
 0x353   : > { %s1778_s14 = sshll.u32 %s1859_s13, 4  ;;  %s1779_s14 = int_to_ptr.vmem [resolvable:$false] %s1778_s14 }
 0x354   : > { %p1776_p1 = pnand %p1775_p0, %p1928_p5  ;;  %s1780_s22 = scalar_lea.vmem %s1779_s14, 256 }
 0x355   : > { %p1781_p3 = scmp.lt.s32.totalorder %s1432_s8, %s1779_s14  ;;  %p1782_p4 = scmp.lt.s32.totalorder %s1780_s22, %s1774_s12 }
 0x356   : > { %p1777_p2 = pneg %p1776_p1 }
 0x357   : > { %p1783_p6 = por %p1782_p4, %p1781_p3 }
 0x359   : > { %p1784_p7 = pnand %p1783_p6, %p1777_p2 }
 0x35b   : > { %1787 = shalt.err (!%p1784_p7)
}
 0x35c   : > { %s1788_s18 = scalar_lea.hbm %s1429_s11, 128  ;;  %s1792_s30 = scalar_lea.hbm %s2157_s4, 256 }
 0x35d   : > { %p1789_p8 = scmp.ne.s32.totalorder %s1429_s11, %s1788_s18  ;;  %p1793_p13 = scmp.lt.u32.totalorder %s1429_s11, %s2157_s4 }
 0x35e   : > { %p1794_p0 = scmp.lt.u32.totalorder %s1792_s30, %s1788_s18  ;;  %p1796_p10 = scmp.lt.u32.totalorder %s1788_s18, %s1429_s11 }
 0x35f   : > { %p1790_p11 = pnand %p1789_p8, %p1928_p5 }
 0x360   : > { %p1795_p1 = por %p1794_p0, %p1793_p13 }
 0x361   : > { %p1791_p12 = pneg %p1790_p11 }
 0x362   : > { %p1797_p3 = por %p1796_p10, %p1795_p1 }
 0x364   : > { %p1798_p2 = pnand %p1797_p3, %p1791_p12 }
 0x366   : > { %1801 = shalt.err (!%p1798_p2)
}
 0x367   : > { %1674 = dma.vmem_to_hbm [thread:$0]  (%p1928_p5), %s1432_s8, 128, %s1429_s11, %s1341_s24  }
 0x368 PF: > { %s1450_s7 = sand.u32 1, %s1832_s15   ;;  %p2162_p4 = scmp.ge.s32.totalorder %s1852_s20, 2 }
 0x369   : > { %s1451_s9 = scalar_lea.sflag [#allocation7], %s1450_s7 }
 0x36a   : > { %p1677_p6 = pnand %p2162_p4, %p1939_p9 }
 0x36c   : > { %1827 = dma.done.wait (!%p1677_p6), %s1451_s9, 128  }
 0x36d   : > { %1829 = vsyncadd (!%p1677_p6), %s1451_s9, 4294967168  ;;  %s18_s20 = sadd.s32 1, %s1852_s20   ;;  %s2163_s15 = smov %s1836_s16 }
 0x36e   : > { %p15_p10 = scmp.ge.s32.totalorder %s18_s20, 4   ;;  %s2164_s16 = smov %s1840_s17 }
 0x36f   : > { %s2165_s17 = smov %s1937_s28  ;;  %s2166_s18 = smov %s1848_s19 }
 0x370   : > { %s2167_s19 = smov %s2169_s23  ;;  %17 = sbr.rel (!%p15_p10) target bundleno = 4 (0x4), region = 268 }
 0x377   :  { %1456 = vsyncpa [#allocation7], 1 }
 0x378   :  { %1458 = vsyncpa [#allocation7 + $0x1], 1 }

</bundles_post_ra>
